<compile_context>
chip_gen: v5e
topology: v5e:2x2
jax: 0.10.0
libtpu: 0.0.40
codegen_flags: <defaults>
</compile_context>

<pallas_src>
import functools

import jax
import jax.numpy as jnp
from jax.experimental import pallas as pl
from jax.experimental.pallas import tpu as pltpu

_CF_PAD = 128   # conv feature channels padded to a full lane width
_D_PAD = 128    # embedding dim padded to a full lane width


def _round_up(x, m):
    return (x + m - 1) // m * m


def _encoder_kernel(x_ref, wc_ref, bc_ref, pw_ref, wl_ref, bl_ref, o_ref,
                    pooled_ref, *, hh, ww):
    """One batch tile (Bt images) per grid step.

    x_ref     : (Bt, P, Cin) bf16  raw zero-padded activations, P=(H+2)*(W+2)
    wc_ref    : (Cin, 9*128) bf16  tap-concatenated conv weights (Cf zero-padded)
    bc_ref    : (1, 128)     f32   conv bias (zero-padded)
    pw_ref    : (Lp, 1)      f32   masked average-pool weights (1/(H*W) on valid rows)
    wl_ref    : (128, 128)   f32   linear weights (Cf/D zero-padded)
    bl_ref    : (1, 128)     f32   linear bias (zero-padded)
    o_ref     : (1, Bt, 128) f32   output embeddings (lane-dense store)
    pooled_ref: (Bt, 128)    f32   VMEM scratch holding pooled features
    """
    bt = x_ref.shape[0]
    wp2 = ww + 2
    lp = hh * wp2 - 2          # base rows covering every valid output pixel

    def per_image(b, carry):
        xb = x_ref[b]                                            # (P, Cin) bf16
        # One MXU push computes all 9 tap partial products side by side on the
        # lane axis: z[:, t*128:(t+1)*128] = x_flat @ wc[tap t].
        z = jnp.dot(xb, wc_ref[...],
                    preferred_element_type=jnp.float32)          # (P, 9*128) f32
        acc = jnp.zeros((lp, _CF_PAD), jnp.float32)
        for dy in range(3):
            for dx in range(3):
                t = dy * 3 + dx
                off = dy * wp2 + dx                              # flat conv shift
                acc = acc + z[off:off + lp, t * _CF_PAD:(t + 1) * _CF_PAD]
        feat = jnp.maximum(acc + bc_ref[...], 0.0)               # (lp, 128) f32
        # Masked global average pool: VPU multiply + cross-sublane reduce
        # (invalid flat rows have pool weight 0).
        pooled_ref[pl.ds(b, 1), :] = jnp.sum(feat * pw_ref[...],
                                             axis=0, keepdims=True)
        return carry

    jax.lax.fori_loop(0, bt, per_image, 0)

    # Final linear projection for the whole batch tile; lane-dense store.
    emb = jnp.dot(pooled_ref[...], wl_ref[...],
                  preferred_element_type=jnp.float32) + bl_ref[...]
    o_ref[0] = emb.astype(o_ref.dtype)


def _vmem_bytes(bt, p, lp):
    """Honest VMEM estimate (lane/sublane padding + double buffering)."""
    p_pad = _round_up(p, 8)
    l_pad = _round_up(lp, 8)
    # bf16 activation block: Cin lane-padded to 128, x2 double-buffered.
    x_blk = 2 * bt * p_pad * 128 * 2
    consts = 2 * (8 * 9 * _CF_PAD * 2          # tap-concat conv weights
                  + _CF_PAD * _D_PAD * 4       # linear weights
                  + 2 * 8 * _CF_PAD * 4        # biases (sublane-padded)
                  + l_pad * 128 * 4)           # pool weights (lane-padded)
    # Per-image live intermediates inside the fori body (one image at a time).
    live = (2 * p_pad * 9 * _CF_PAD * 4        # z and one shifted-slice temp
            + 3 * l_pad * _CF_PAD * 4          # acc / feat / temp
            + 2 * p_pad * 128 * 2)             # loaded xb (lane-padded)
    out_blk = 2 * bt * _D_PAD * 4 + bt * _CF_PAD * 4
    return x_blk + consts + live + out_blk


def _is_multicore_chip():
    """True on chips where a 'parallel' grid axis shards across >1 TensorCore."""
    try:
        kind = jax.devices()[0].device_kind.lower()
    except Exception:
        return False
    return any(tag in kind for tag in ("v4", "v5p", "v7", "7x"))


def _choose_batch_tile(batch, p, lp):
    try:
        vmem_cap = int(pltpu.get_tpu_info().vmem_capacity_bytes)
    except Exception:
        vmem_cap = 64 * 1024 * 1024
    budget = min(vmem_cap // 4, 12 * 1024 * 1024)

    bt = 1
    for cand in range(2, min(batch, 64) + 1):
        if _vmem_bytes(cand, p, lp) <= budget:
            bt = cand
        else:
            break
    # Only multi-core chips (v4/v5p megacore, v7x 2xTC) benefit from keeping
    # >=2 grid steps; on single-core v5e/v6e a bigger tile is strictly better.
    if _is_multicore_chip() and batch >= 2:
        bt = min(bt, max(1, batch // 2))
    return max(1, bt)


def base_encoder_forward(x_nchw, params, batch_tile=None):
    """x_nchw: (B, Cin, H, W) float32 -> (B, D) float32 embedding."""
    wc, bc, wl, bl = params["wc"], params["bc"], params["wl"], params["bl"]
    B, Cin, H, W = x_nchw.shape
    Cf = wc.shape[-1]
    D = wl.shape[-1]
    assert Cf <= _CF_PAD and D <= _D_PAD

    P = (H + 2) * (W + 2)       # flat length of one spatially-padded image
    Lp = H * (W + 2) - 2        # contiguous base rows covering all valid pixels

    Bt = batch_tile if batch_tile is not None else _choose_batch_tile(B, P, Lp)
    n_steps = pl.cdiv(B, Bt)
    Bp = n_steps * Bt

    # NCHW -> NHWC, batch pad to a multiple of Bt, spatial zero-pad of 1,
    # flatten (h, w) and cast the streamed activations to bf16.
    x = jnp.transpose(x_nchw, (0, 2, 3, 1))
    if Bp != B:
        x = jnp.pad(x, ((0, Bp - B), (0, 0), (0, 0), (0, 0)))
    x = jnp.pad(x, ((0, 0), (1, 1), (1, 1), (0, 0)))
    x_flat = x.reshape(Bp, P, Cin).astype(jnp.bfloat16)

    # Conv weights: (3,3,Cin,Cf) -> tap-concatenated (Cin, 9*128), bf16.
    wc9 = jnp.pad(wc.reshape(9, Cin, Cf), ((0, 0), (0, 0), (0, _CF_PAD - Cf)))
    wc_cat = jnp.transpose(wc9, (1, 0, 2)).reshape(Cin, 9 * _CF_PAD)
    wc_cat = wc_cat.astype(jnp.bfloat16)

    bc_row = jnp.pad(bc.reshape(1, Cf), ((0, 0), (0, _CF_PAD - Cf))).astype(jnp.float32)
    wl_mat = jnp.pad(wl, ((0, _CF_PAD - Cf), (0, _D_PAD - D))).astype(jnp.float32)
    bl_row = jnp.pad(bl.reshape(1, D), ((0, 0), (0, _D_PAD - D))).astype(jnp.float32)

    # Pool weights over flat base rows q in [0, Lp): valid iff (q mod (W+2)) < W.
    q = jnp.arange(Lp)
    valid = (q % (W + 2)) < W
    pool_w = (valid.astype(jnp.float32) / float(H * W)).reshape(Lp, 1)

    kernel = functools.partial(_encoder_kernel, hh=H, ww=W)

    vmem_est = _vmem_bytes(Bt, P, Lp)
    vmem_limit = int(min(max(2 * vmem_est, 16 * 1024 * 1024), 28 * 1024 * 1024))

    out = pl.pallas_call(
        kernel,
        out_shape=jax.ShapeDtypeStruct((n_steps, Bt, _D_PAD), jnp.float32),
        grid_spec=pltpu.PrefetchScalarGridSpec(
            num_scalar_prefetch=0,
            grid=(n_steps,),
            in_specs=[
                pl.BlockSpec((Bt, P, Cin), lambda g: (g, 0, 0)),
                pl.BlockSpec((Cin, 9 * _CF_PAD), lambda g: (0, 0)),
                pl.BlockSpec((1, _CF_PAD), lambda g: (0, 0)),
                pl.BlockSpec((Lp, 1), lambda g: (0, 0)),
                pl.BlockSpec((_CF_PAD, _D_PAD), lambda g: (0, 0)),
                pl.BlockSpec((1, _D_PAD), lambda g: (0, 0)),
            ],
            out_specs=pl.BlockSpec((1, Bt, _D_PAD), lambda g: (g, 0, 0)),
            scratch_shapes=[pltpu.VMEM((Bt, _CF_PAD), jnp.float32)],
        ),
        compiler_params=pltpu.CompilerParams(
            dimension_semantics=("parallel",),
            vmem_limit_bytes=vmem_limit),
    )(x_flat, wc_cat, bc_row, pool_w, wl_mat, bl_row)

    # Strip batch padding and lane padding.
    return out.reshape(Bp, _D_PAD)[:B, :D]


def _reference_forward(x_nchw, params):
    """Pure-JAX reference of the same synthetic encoder.

    The streamed operands (x, conv weights) are quantized to bf16 exactly as
    the kernel streams them, so the comparison stays tight.
    """
    wc = params["wc"].astype(jnp.bfloat16).astype(jnp.float32)
    bc, wl, bl = params["bc"], params["wl"], params["bl"]
    x = jnp.transpose(x_nchw, (0, 2, 3, 1)).astype(jnp.bfloat16).astype(jnp.float32)
    x_pad = jnp.pad(x, ((0, 0), (1, 1), (1, 1), (0, 0)))
    B, H, W, Cin = x.shape
    Cf = wc.shape[-1]
    acc = jnp.zeros((B, H, W, Cf), jnp.float32)
    for dy in range(3):
        for dx in range(3):
            patch = x_pad[:, dy:dy + H, dx:dx + W, :]
            acc = acc + jnp.einsum("bhwc,cf->bhwf", patch, wc[dy, dx])
    feat = jnp.maximum(acc + bc, 0.0)
    pooled = feat.mean(axis=(1, 2))                        # (B, Cf)
    return pooled @ wl + bl


def make_params(key, cin=4, cf=8, d=32):
    k1, k2, k3, k4 = jax.random.split(key, 4)
    return {
        "wc": jax.random.normal(k1, (3, 3, cin, cf), jnp.float32) * 0.1,
        "bc": jax.random.normal(k2, (cf,), jnp.float32) * 0.1,
        "wl": jax.random.normal(k3, (cf, d), jnp.float32) * 0.1,
        "bl": jax.random.normal(k4, (d,), jnp.float32) * 0.1,
    }


if __name__ == "__main__":
    key = jax.random.PRNGKey(0)
    kx, kp = jax.random.split(key)

    B, Cin, H, W = 2, 4, 16, 16
    x = jax.random.normal(kx, (B, Cin, H, W), jnp.float32)
    params = make_params(kp, cin=Cin, cf=8, d=32)

    out = base_encoder_forward(x, params)
    out = jax.block_until_ready(out)

    ref = _reference_forward(x, params)
    assert out.shape == (B, 32), out.shape
    assert jnp.allclose(out, ref, atol=1e-2, rtol=1e-2), "mismatch vs reference"

    print("KERNEL_OK")
</pallas_src>

<mosaic_0001>
module attributes {stable_mosaic.version = 11 : i64} {
  func.func @_encoder_kernel(%arg0: i32, %arg1: memref<2x324x4xbf16, #tpu.memory_space<vmem>>, %arg2: memref<4x1152xbf16, #tpu.memory_space<vmem>>, %arg3: memref<1x128xf32, #tpu.memory_space<vmem>>, %arg4: memref<286x1xf32, #tpu.memory_space<vmem>>, %arg5: memref<128x128xf32, #tpu.memory_space<vmem>>, %arg6: memref<1x128xf32, #tpu.memory_space<vmem>>, %arg7: memref<1x2x128xf32, #tpu.memory_space<vmem>>, %arg8: memref<2x128xf32, #tpu.memory_space<vmem>>) attributes {dimension_semantics = [#tpu.dimension_semantics<parallel>], iteration_bounds = array<i64: 1>, scalar_prefetch = 0 : i64, scratch_operands = 1 : i64, tpu.core_type = #tpu.core_type<tc>, window_params = [{transform_indices = @transform_0, window_bounds = array<i64: 2, 324, 4>}, {pipeline_mode = #tpu.pipeline_mode<synchronous>, transform_indices = @transform_1, window_bounds = array<i64: 4, 1152>}, {pipeline_mode = #tpu.pipeline_mode<synchronous>, transform_indices = @transform_2, window_bounds = array<i64: 1, 128>}, {pipeline_mode = #tpu.pipeline_mode<synchronous>, transform_indices = @transform_3, window_bounds = array<i64: 286, 1>}, {pipeline_mode = #tpu.pipeline_mode<synchronous>, transform_indices = @transform_4, window_bounds = array<i64: 128, 128>}, {pipeline_mode = #tpu.pipeline_mode<synchronous>, transform_indices = @transform_5, window_bounds = array<i64: 1, 128>}, {transform_indices = @transform_6, window_bounds = array<i64: 1, 2, 128>}]} {
    %c0_i32 = arith.constant 0 : i32
    %c2_i32 = arith.constant 2 : i32
    %0 = arith.addi %c0_i32, %c2_i32 : i32
    %c1_i32 = arith.constant 1 : i32
    scf.for %arg9 = %c0_i32 to %0 step %c1_i32  : i32 {
      %10 = arith.index_cast %arg9 : i32 to index
      %c0_9 = arith.constant 0 : index
      %c0_10 = arith.constant 0 : index
      %11 = vector.load %arg1[%10, %c0_9, %c0_10] : memref<2x324x4xbf16, #tpu.memory_space<vmem>>, vector<1x324x4xbf16>
      %12 = vector.shape_cast %11 : vector<1x324x4xbf16> to vector<324x4xbf16>
      %c0_11 = arith.constant 0 : index
      %c0_12 = arith.constant 0 : index
      %13 = vector.load %arg2[%c0_11, %c0_12] : memref<4x1152xbf16, #tpu.memory_space<vmem>>, vector<4x1152xbf16>
      %cst_13 = arith.constant dense<0.000000e+00> : vector<324x1152xf32>
      %14 = tpu.matmul %12, %13, %cst_13 {dimension_numbers = #tpu.dot_dimension_numbers<[1], [0], [0], [1], [0, 0, 1, 1], [], []>} : vector<324x4xbf16>, vector<4x1152xbf16>, vector<324x1152xf32> -> vector<324x1152xf32>
      %cst_14 = arith.constant 0.000000e+00 : f32
      %15 = vector.broadcast %cst_14 : f32 to vector<286x128xf32>
      %16 = vector.extract_strided_slice %14 {offsets = [0, 0], sizes = [286, 128], strides = [1, 1]} : vector<324x1152xf32> to vector<286x128xf32>
      %17 = arith.addf %15, %16 : vector<286x128xf32>
      %18 = vector.extract_strided_slice %14 {offsets = [1, 128], sizes = [286, 128], strides = [1, 1]} : vector<324x1152xf32> to vector<286x128xf32>
      %19 = arith.addf %17, %18 : vector<286x128xf32>
      %20 = vector.extract_strided_slice %14 {offsets = [2, 256], sizes = [286, 128], strides = [1, 1]} : vector<324x1152xf32> to vector<286x128xf32>
      %21 = arith.addf %19, %20 : vector<286x128xf32>
      %22 = vector.extract_strided_slice %14 {offsets = [18, 384], sizes = [286, 128], strides = [1, 1]} : vector<324x1152xf32> to vector<286x128xf32>
      %23 = arith.addf %21, %22 : vector<286x128xf32>
      %24 = vector.extract_strided_slice %14 {offsets = [19, 512], sizes = [286, 128], strides = [1, 1]} : vector<324x1152xf32> to vector<286x128xf32>
      %25 = arith.addf %23, %24 : vector<286x128xf32>
      %26 = vector.extract_strided_slice %14 {offsets = [20, 640], sizes = [286, 128], strides = [1, 1]} : vector<324x1152xf32> to vector<286x128xf32>
      %27 = arith.addf %25, %26 : vector<286x128xf32>
      %28 = vector.extract_strided_slice %14 {offsets = [36, 768], sizes = [286, 128], strides = [1, 1]} : vector<324x1152xf32> to vector<286x128xf32>
      %29 = arith.addf %27, %28 : vector<286x128xf32>
      %30 = vector.extract_strided_slice %14 {offsets = [37, 896], sizes = [286, 128], strides = [1, 1]} : vector<324x1152xf32> to vector<286x128xf32>
      %31 = arith.addf %29, %30 : vector<286x128xf32>
      %32 = vector.extract_strided_slice %14 {offsets = [38, 1024], sizes = [286, 128], strides = [1, 1]} : vector<324x1152xf32> to vector<286x128xf32>
      %33 = arith.addf %31, %32 : vector<286x128xf32>
      %c0_15 = arith.constant 0 : index
      %c0_16 = arith.constant 0 : index
      %34 = vector.load %arg3[%c0_15, %c0_16] : memref<1x128xf32, #tpu.memory_space<vmem>>, vector<1x128xf32>
      %35 = vector.broadcast %34 : vector<1x128xf32> to vector<286x128xf32>
      %36 = arith.addf %33, %35 : vector<286x128xf32>
      %cst_17 = arith.constant 0.000000e+00 : f32
      %37 = vector.broadcast %cst_17 : f32 to vector<286x128xf32>
      %38 = arith.maximumf %36, %37 : vector<286x128xf32>
      %c0_18 = arith.constant 0 : index
      %c0_19 = arith.constant 0 : index
      %39 = vector.load %arg4[%c0_18, %c0_19] : memref<286x1xf32, #tpu.memory_space<vmem>>, vector<286x1xf32>
      %40 = vector.broadcast %39 : vector<286x1xf32> to vector<286x128xf32>
      %41 = arith.mulf %38, %40 : vector<286x128xf32>
      %cst_20 = arith.constant dense<0.000000e+00> : vector<128xf32>
      %42 = vector.multi_reduction <add>, %41, %cst_20 [0] : vector<286x128xf32> to vector<128xf32>
      %43 = vector.shape_cast %42 : vector<128xf32> to vector<1x128xf32>
      %44 = arith.index_cast %arg9 : i32 to index
      %c0_21 = arith.constant 0 : index
      %45 = vector.load %arg8[%44, %c0_21] : memref<2x128xf32, #tpu.memory_space<vmem>>, vector<1x128xf32>
      tpu.vector_store %arg8[%44, %c0_21], %43 {strides = array<i32>} : memref<2x128xf32, #tpu.memory_space<vmem>>, vector<1x128xf32>,
    }
    %c2_i32_0 = arith.constant 2 : i32
    %c0 = arith.constant 0 : index
    %c0_1 = arith.constant 0 : index
    %1 = vector.load %arg8[%c0, %c0_1] : memref<2x128xf32, #tpu.memory_space<vmem>>, vector<2x128xf32>
    %c0_2 = arith.constant 0 : index
    %c0_3 = arith.constant 0 : index
    %2 = vector.load %arg5[%c0_2, %c0_3] : memref<128x128xf32, #tpu.memory_space<vmem>>, vector<128x128xf32>
    %cst = arith.constant dense<0.000000e+00> : vector<2x128xf32>
    %3 = tpu.matmul %1, %2, %cst {dimension_numbers = #tpu.dot_dimension_numbers<[1], [0], [0], [1], [0, 0, 1, 1], [], []>} : vector<2x128xf32>, vector<128x128xf32>, vector<2x128xf32> -> vector<2x128xf32>
    %c0_4 = arith.constant 0 : index
    %c0_5 = arith.constant 0 : index
    %4 = vector.load %arg6[%c0_4, %c0_5] : memref<1x128xf32, #tpu.memory_space<vmem>>, vector<1x128xf32>
    %5 = vector.broadcast %4 : vector<1x128xf32> to vector<2x128xf32>
    %6 = arith.addf %3, %5 : vector<2x128xf32>
    %c0_6 = arith.constant 0 : index
    %c0_7 = arith.constant 0 : index
    %c0_8 = arith.constant 0 : index
    %7 = vector.load %arg7[%c0_6, %c0_7, %c0_8] : memref<1x2x128xf32, #tpu.memory_space<vmem>>, vector<1x2x128xf32>
    %8 = vector.shape_cast %7 : vector<1x2x128xf32> to vector<2x128xf32>
    %9 = vector.shape_cast %6 : vector<2x128xf32> to vector<1x2x128xf32>
    tpu.vector_store %arg7[%c0_6, %c0_7, %c0_8], %9 {strides = array<i32>} : memref<1x2x128xf32, #tpu.memory_space<vmem>>, vector<1x2x128xf32>,
    return
  }
  func.func @transform_0(%arg0: i32) -> (i32, i32, i32) {
    %c0_i32 = arith.constant 0 : i32
    %c0_i32_0 = arith.constant 0 : i32
    %c0_i32_1 = arith.constant 0 : i32
    return %arg0, %c0_i32, %c0_i32_0 : i32, i32, i32
  }
  func.func @transform_1(%arg0: i32) -> (i32, i32) {
    %c0_i32 = arith.constant 0 : i32
    %c0_i32_0 = arith.constant 0 : i32
    %c0_i32_1 = arith.constant 0 : i32
    return %c0_i32, %c0_i32_0 : i32, i32
  }
  func.func @transform_2(%arg0: i32) -> (i32, i32) {
    %c0_i32 = arith.constant 0 : i32
    %c0_i32_0 = arith.constant 0 : i32
    %c0_i32_1 = arith.constant 0 : i32
    return %c0_i32, %c0_i32_0 : i32, i32
  }
  func.func @transform_3(%arg0: i32) -> (i32, i32) {
    %c0_i32 = arith.constant 0 : i32
    %c0_i32_0 = arith.constant 0 : i32
    %c0_i32_1 = arith.constant 0 : i32
    return %c0_i32, %c0_i32_0 : i32, i32
  }
  func.func @transform_4(%arg0: i32) -> (i32, i32) {
    %c0_i32 = arith.constant 0 : i32
    %c0_i32_0 = arith.constant 0 : i32
    %c0_i32_1 = arith.constant 0 : i32
    return %c0_i32, %c0_i32_0 : i32, i32
  }
  func.func @transform_5(%arg0: i32) -> (i32, i32) {
    %c0_i32 = arith.constant 0 : i32
    %c0_i32_0 = arith.constant 0 : i32
    %c0_i32_1 = arith.constant 0 : i32
    return %c0_i32, %c0_i32_0 : i32, i32
  }
  func.func @transform_6(%arg0: i32) -> (i32, i32, i32) {
    %c0_i32 = arith.constant 0 : i32
    %c0_i32_0 = arith.constant 0 : i32
    %c0_i32_1 = arith.constant 0 : i32
    return %arg0, %c0_i32, %c0_i32_0 : i32, i32, i32
  }
}

</mosaic_0001>

<bundles_post_ra>
// kernel: tpu_custom_call.1
= control target key start
LH: loop header
LB: loop body
LE: loop exit
PB: predicated region body
PF: predicated region fallthrough
CT: control target
= control target key end

     0   :  { %11 = vsyncpa [#allocation4], 0  ;;  %s3585_s21 = smov 0   ;;  %s5061_s0 = inlined_call_operand.vmem [shape: bf16[2,324,4], index: 0, kind: input, shape index: {}]   ;;  %s5062_s1 = inlined_call_operand.vmem [shape: bf16[4,1152], index: 1, kind: input, shape index: {}]   ;;  %s5063_s2 = inlined_call_operand.vmem [shape: f32[1,128], index: 2, kind: input, shape index: {}]   ;;  %s5064_s3 = inlined_call_operand.vmem [shape: f32[286,1], index: 3, kind: input, shape index: {}]   ;;  %s5065_s4 = inlined_call_operand.vmem [shape: f32[128,128], index: 4, kind: input, shape index: {}]   ;;  %s5066_s5 = inlined_call_operand.vmem [shape: f32[1,128], index: 5, kind: input, shape index: {}]   ;;  %s5067_s6 = inlined_call_operand.hbm [shape: f32[1,2,128], index: 6, kind: output, shape index: {}]  }
   0x1 LB: > { %v75_v0 = vld [vmem:[%s5062_s1] sm:$0xff]  ;;  %v76_v1 = vld [vmem:[%s5062_s1 + $0x8] sm:$0xff]  ;;  %s3453_s26 = smul.u32 164, %s3546_s21  ;;  %vm261_vm0 = vcmask 1041408   ;;  %vm197_vm1 = vcmask 31744   ;;  %vm1509_vm2 = vcmask 1045504   ;;  %s3546_s21 = sphi %s3585_s21, %s30_s21  }
   0x2   : > { %182 = vst [vmem:[#allocation1] ss:$4 sm:$0xff] %v75_v0  ;;  %v77_v18 = vld [vmem:[%s5062_s1 + $0x10] sm:$0x3]  ;;  %vm1329_vm3 = vcmask 1046528   ;;  %vm1869_vm4 = vcmask 1044480  }
   0x3   : > { %185 = vst [vmem:[#allocation1 + $0x20] ss:$4 sm:$0xff] %v76_v1  ;;  %s3600_s29 = scalar_lea.vmem %s5061_s0, %s3453_s26  ;;  %vm2417_vm5 = vcmask 1042432   ;;  %vm2052_vm6 = vcmask 1043456   ;;  %s3115_s17 = scalar_lea.vmem [#allocation2], %s3546_s21 }
   0x4   : > { %v3603_v2 = vld [vmem:[%s3600_s29] sm:$0xff]  ;;  %v3607_v6 = vld [vmem:[%s3600_s29 + $0x30] sm:$0xff]  ;;  %v3455_v14 = vld [vmem:[%s3600_s29 + $0x8] sm:$0xff]  ;;  %s30_s21 = sadd.s32 1, %s3546_s21  }
   0x5   : > { %v3611_v9 = vld [vmem:[%s3600_s29 + $0x60] sm:$0xff]  ;;  %v3622_v13 = vld [vmem:[%s3600_s29 + $0x90] sm:$0xff]  ;;  %v3628_v15 = vld [vmem:[%s3600_s29 + $0x38] sm:$0xff]  ;;  %p27_p0 = scmp.ge.s32.totalorder %s30_s21, 2  }
   0x6   : > { %v3631_v16 = vld [vmem:[%s3600_s29 + $0x68] sm:$0xff]  ;;  %v3639_v17 = vld [vmem:[%s3600_s29 + $0x98] sm:$0xff]  ;;  %v3456_v21 = vld [vmem:[%s3600_s29 + $0x10] sm:$0xff]  ;;  %s3549_s25 = smov (%p27_p0), [#allocation3]   ;;  %s3166_s1 = sshll.u32 (%p27_p0), %s5067_s6, 4  ;;  %s3167_s1 = int_to_ptr.hbm [resolvable:$true] %s3166_s1 }
   0x7   : > { %v3649_v22 = vld [vmem:[%s3600_s29 + $0x40] sm:$0xff]  ;;  %v3652_v23 = vld [vmem:[%s3600_s29 + $0x70] sm:$0xff]  ;;  %v3457_v27 = vld [vmem:[%s3600_s29 + $0x18] sm:$0xff]  ;;  %s3164_s26 = sshll.u32 (%p27_p0), %s3549_s25, 4  ;;  %s3165_s26 = int_to_ptr.vmem [resolvable:$true] %s3164_s26 }
   0x8   : > { %v74_v24 = vld [vmem:[%s3600_s29 + $0xa0] sm:$0x3]  ;;  %v3666_v28 = vld [vmem:[%s3600_s29 + $0x48] sm:$0xff]  ;;  %v3669_v29 = vld [vmem:[%s3600_s29 + $0x78] sm:$0xff] }
   0x9   : > { %v186_v3 = vld.sshfl [vmem:[#allocation1] sm:$0xff pattern:$0x73625140]  ;;  %v188_v4 = vld.sshfl [vmem:[#allocation1 + $0x10] sm:$0xff pattern:$0x73625140]  ;;  %v159_v25 = vunpack.c.l.b16 %v74_v24 }
   0xa   : > { %v262_v5 = vsel %vm261_vm0, %v186_v3, 0  ;;  %v266_v7 = vsel %vm261_vm0, %v188_v4, 0  ;;  %v190_v8 = vld.sshfl [vmem:[#allocation1 + $0x20] sm:$0xff pattern:$0x73625140]  ;;  %v3680_v31 = vld [vmem:[%s3600_s29 + $0x50] sm:$0xff] }
   0xb   : > { %287 = vmatpush.bf16.msra.mxu0 %v262_v5  ;;  %3474 = vmatpush.bf16.msra.mxu1 %v262_v5  ;;  %v270_v10 = vsel %vm261_vm0, %v190_v8, 0  ;;  %v187_v11 = vld.sshfl [vmem:[#allocation1 + $0x8] sm:$0xff pattern:$0x73625140]  ;;  %v3660_v26 = vpack.c.b16 %v159_v25, %v159_v25  ;;  %v3458_v30 = vld [vmem:[%s3600_s29 + $0x20] sm:$0xff]  ;;  %v3696_v40 = vld [vmem:[%s3600_s29 + $0x58] sm:$0xff] }
   0xc   : > { %3475 = vmatpush.bf16.msra.mxu2 %v262_v5  ;;  %v264_v12 = vsel %vm261_vm0, %v187_v11, 0  ;;  %3476 = vmatpush.bf16.msra.mxu3 %v262_v5  ;;  %v189_v19 = vld.sshfl [vmem:[#allocation1 + $0x18] sm:$0xff pattern:$0x73625140]  ;;  %v3683_v32 = vld [vmem:[%s3600_s29 + $0x80] sm:$0xff]  ;;  %v3459_v39 = vld [vmem:[%s3600_s29 + $0x28] sm:$0xff] }
   0xd   : > { %195 = vst [vmem:[#allocation1] ss:$4 sm:$0xff] %v77_v18  ;;  %v268_v20 = vsel %vm261_vm0, %v189_v19, 0  ;;  %v192_v33 = vld.sshfl [vmem:[#allocation1 + $0x30] sm:$0xff pattern:$0x73625140] }
   0xe   : > { %3264 = vmatmul.msk.bf16.vlgmr.msra.gmra.mxu0 %vm197_vm1, %v3603_v2  ;;  %3270 = vmatmul.msk.bf16.vlgmr.msra.gmra.mxu1 %vm197_vm1, %v3607_v6  ;;  %v193_v34 = vld.sshfl [vmem:[#allocation1 + $0x38] sm:$0xff pattern:$0x73625140]  ;;  %v274_v35 = vsel %vm261_vm0, %v192_v33, 0  ;;  %v3699_v41 = vld [vmem:[%s3600_s29 + $0x88] sm:$0xff] }
   0xf   : > { %719 = vmatpush.bf16.msrb.mxu0 %v270_v10  ;;  %395 = vmatpush.bf16.msrb.mxu1 %v264_v12  ;;  %v276_v36 = vsel %vm261_vm0, %v193_v34, 0  ;;  %v191_v42 = vld.sshfl [vmem:[#allocation1 + $0x28] sm:$0xff pattern:$0x73625140] }
  0x10   : > { %503 = vmatpush.bf16.msrb.mxu2 %v266_v7  ;;  %3282 = vmatmul.msk.bf16.vlgmr.msra.gmra.mxu3 %vm197_vm1, %v3622_v13  ;;  %v272_v43 = vsel %vm261_vm0, %v191_v42, 0 }
  0x11   : > { %3276 = vmatmul.msk.bf16.vlgmr.msra.gmra.mxu2 %vm197_vm1, %v3611_v9  ;;  %611 = vmatpush.bf16.msrb.mxu3 %v268_v20 }
  0x13   : > { %828 = vmatpush.bf16.msra.mxu1 %v272_v43 }
  0x14   : > { %v196_v37 = vld.sshfl [vmem:[#allocation1] sm:$0xff pattern:$0x73625140]  ;;  %937 = vmatpush.bf16.msra.mxu2 %v274_v35 }
  0x15   : > { %1046 = vmatpush.bf16.msra.mxu3 %v276_v36  ;;  %v278_v38 = vsel %vm261_vm0, %v196_v37, 0 }
  0x16   : > { %1155 = vmatpush.bf16.msra.mxu0 %v278_v38 }
  0x1e   : > { %3265 = vmatmul.msk.bf16.gmra.mxu0 %vm197_vm1, %v3455_v14  ;;  %3271 = vmatmul.msk.bf16.gmra.mxu1 %vm197_vm1, %v3628_v15 }
  0x20   : > { %3283 = vmatmul.msk.bf16.gmra.mxu3 %vm197_vm1, %v3639_v17 }
  0x21   : > { %3277 = vmatmul.msk.bf16.gmra.mxu2 %vm197_vm1, %v3631_v16 }
  0x2e   : > { %3266 = vmatmul.msk.bf16.gmra.mxu0 %vm197_vm1, %v3456_v21  ;;  %3272 = vmatmul.msk.bf16.gmra.mxu1 %vm197_vm1, %v3649_v22 }
  0x30   : > { %3284 = vmatmul.msk.bf16.gmra.mxu3 %vm197_vm1, %v3660_v26 }
  0x31   : > { %3278 = vmatmul.msk.bf16.gmra.mxu2 %vm197_vm1, %v3652_v23 }
  0x3e   : > { %3267 = vmatmul.msk.bf16.gmra.mxu0 %vm197_vm1, %v3457_v27  ;;  %3273 = vmatmul.msk.bf16.gmra.mxu1 %vm197_vm1, %v3666_v28 }
  0x40   : > { %3327 = vmatmul.msk.bf16.vlgmr.msrb.gmra.mxu3 %vm197_vm1, %v3603_v2 }
  0x41   : > { %3279 = vmatmul.msk.bf16.gmra.mxu2 %vm197_vm1, %v3669_v29 }
  0x4e   : > { %3268 = vmatmul.msk.bf16.gmra.mxu0 %vm197_vm1, %v3458_v30  ;;  %3274 = vmatmul.msk.bf16.gmra.mxu1 %vm197_vm1, %v3680_v31 }
  0x50   : > { %3328 = vmatmul.msk.bf16.gmra.mxu3 %vm197_vm1, %v3455_v14 }
  0x51   : > { %3280 = vmatmul.msk.bf16.gmra.mxu2 %vm197_vm1, %v3683_v32 }
  0x5e   : > { %3269 = vmatmul.msk.bf16.gmra.mxu0 %vm197_vm1, %v3459_v39  ;;  %3275 = vmatmul.msk.bf16.gmra.mxu1 %vm197_vm1, %v3696_v40 }
  0x60   : > { %3329 = vmatmul.msk.bf16.gmra.mxu3 %vm197_vm1, %v3456_v21 }
  0x61   : > { %3281 = vmatmul.msk.bf16.gmra.mxu2 %vm197_vm1, %v3699_v41 }
  0x6e   : > { %3285 = vmatmul.msk.bf16.vlgmr.msrb.gmra.mxu1 %vm197_vm1, %v3603_v2  ;;  %3348 = vmatmul.msk.bf16.vlgmr.msrb.gmra.mxu0 %vm197_vm1, %v3603_v2 }
  0x70   : > { %3330 = vmatmul.msk.bf16.gmra.mxu3 %vm197_vm1, %v3457_v27 }
  0x71   : > { %3306 = vmatmul.msk.bf16.vlgmr.msrb.gmra.mxu2 %vm197_vm1, %v3603_v2 }
  0x7e   : > { %3286 = vmatmul.msk.bf16.gmra.mxu1 %vm197_vm1, %v3455_v14  ;;  %3349 = vmatmul.msk.bf16.gmra.mxu0 %vm197_vm1, %v3455_v14 }
  0x80   : > { %3331 = vmatmul.msk.bf16.gmra.mxu3 %vm197_vm1, %v3458_v30 }
  0x81   : > { %3307 = vmatmul.msk.bf16.gmra.mxu2 %vm197_vm1, %v3455_v14 }
  0x8b   : > { %v3719_v44 = vpop.f32.mrf.mxu0  ;;  %v3721_v45 = vpop.f32.mrf.mxu1 }
  0x8e   : > { %3287 = vmatmul.msk.bf16.gmra.mxu1 %vm197_vm1, %v3456_v21  ;;  %3350 = vmatmul.msk.bf16.gmra.mxu0 %vm197_vm1, %v3456_v21 }
  0x90   : > { %3332 = vmatmul.msk.bf16.gmra.mxu3 %vm197_vm1, %v3459_v39 }
  0x91   : > { %3308 = vmatmul.msk.bf16.gmra.mxu2 %vm197_vm1, %v3456_v21 }
  0x93   : > { %v3729_v47 = vpop.f32.mrf.mxu0  ;;  %v3731_v48 = vpop.f32.mrf.mxu1 }
  0x94   : > { %v3726_v46 = vpop.f32.mrf.mxu2  ;;  %v379_v49 = vpop.f32.mrf.mxu3 }
  0x9b   : > { %v3735_v51 = vpop.f32.mrf.mxu0  ;;  %v3737_v52 = vpop.f32.mrf.mxu1 }
  0x9c   : > { %v3733_v50 = vpop.f32.mrf.mxu2  ;;  %v380_v53 = vpop.f32.mrf.mxu3 }
  0x9e   : > { %3288 = vmatmul.msk.bf16.gmra.mxu1 %vm197_vm1, %v3457_v27  ;;  %3351 = vmatmul.msk.bf16.gmra.mxu0 %vm197_vm1, %v3457_v27 }
  0xa0   : > { %3333 = vmatmul.msk.bf16.gmra.mxu3 %vm197_vm1, %v3607_v6 }
  0xa1   : > { %3309 = vmatmul.msk.bf16.gmra.mxu2 %vm197_vm1, %v3457_v27 }
  0xa3   : > { %v3746_v55 = vpop.f32.mrf.mxu0  ;;  %v3748_v56 = vpop.f32.mrf.mxu1 }
  0xa4   : > { %v3742_v54 = vpop.f32.mrf.mxu2  ;;  %v382_v57 = vpop.f32.mrf.mxu3 }
  0xab   : > { %v3752_v59 = vpop.f32.mrf.mxu0  ;;  %v3754_v60 = vpop.f32.mrf.mxu1 }
  0xac   : > { %v3750_v58 = vpop.f32.mrf.mxu2  ;;  %v383_v61 = vpop.f32.mrf.mxu3 }
  0xad   : > { %5068 = vst [vmem:[#allocation6_spill] sm:$0xff] %v3750_v58 }
  0xae   : > { %3289 = vmatmul.msk.bf16.gmra.mxu1 %vm197_vm1, %v3458_v30  ;;  %3352 = vmatmul.msk.bf16.gmra.mxu0 %vm197_vm1, %v3458_v30 }
  0xb0   : > { %3334 = vmatmul.msk.bf16.gmra.mxu3 %vm197_vm1, %v3628_v15 }
  0xb1   : > { %3310 = vmatmul.msk.bf16.gmra.mxu2 %vm197_vm1, %v3458_v30 }
  0xb3   : > { %v3763_v63 = vpop.f32.mrf.mxu0  ;;  %v3765_v0 = vpop.f32.mrf.mxu1 }
  0xb4   : > { %v3759_v62 = vpop.f32.mrf.mxu2  ;;  %v385_v1 = vpop.f32.mrf.mxu3 }
  0xb5   : > { %5069 = vst [vmem:[#allocation7_spill] sm:$0xff] %v3759_v62 }
  0xbb   : > { %v3769_v3 = vpop.f32.mrf.mxu0  ;;  %v3771_v4 = vpop.f32.mrf.mxu1 }
  0xbc   : > { %v3767_v2 = vpop.f32.mrf.mxu2  ;;  %v386_v5 = vpop.f32.mrf.mxu3 }
  0xbd   : > { %5070 = vst [vmem:[#allocation8_spill] sm:$0xff] %v3767_v2 }
  0xbe   : > { %3290 = vmatmul.msk.bf16.gmra.mxu1 %vm197_vm1, %v3459_v39  ;;  %3353 = vmatmul.msk.bf16.gmra.mxu0 %vm197_vm1, %v3459_v39 }
  0xc0   : > { %3335 = vmatmul.msk.bf16.gmra.mxu3 %vm197_vm1, %v3649_v22 }
  0xc1   : > { %3311 = vmatmul.msk.bf16.gmra.mxu2 %vm197_vm1, %v3459_v39 }
  0xc3   : > { %v3780_v8 = vpop.f32.mrf.mxu0  ;;  %v3782_v10 = vpop.f32.mrf.mxu1 }
  0xc4   : > { %v3776_v7 = vpop.f32.mrf.mxu2  ;;  %v613_v11 = vpop.f32.mrf.mxu3 }
  0xc5   : > { %5071 = vst [vmem:[#allocation9_spill] sm:$0xff] %v3776_v7 }
  0xcb   : > { %v3786_v14 = vpop.f32.mrf.mxu0  ;;  %v3788_v18 = vpop.f32.mrf.mxu1 }
  0xcc   : > { %v3784_v12 = vpop.f32.mrf.mxu2  ;;  %v614_v19 = vpop.f32.mrf.mxu3 }
  0xcd   : > { %5072 = vst [vmem:[#allocation10_spill] sm:$0xff] %v3784_v12 }
  0xce   : > { %3291 = vmatmul.msk.bf16.gmra.mxu1 %vm197_vm1, %v3607_v6  ;;  %3354 = vmatmul.msk.bf16.gmra.mxu0 %vm197_vm1, %v3607_v6 }
  0xd0   : > { %3336 = vmatmul.msk.bf16.gmra.mxu3 %vm197_vm1, %v3666_v28 }
  0xd1   : > { %3312 = vmatmul.msk.bf16.gmra.mxu2 %vm197_vm1, %v3607_v6 }
  0xd3   : > { %v3800_v21 = vpop.f32.mrf.mxu0  ;;  %v3802_v24 = vpop.f32.mrf.mxu1 }
  0xd4   : > { %v3796_v20 = vpop.f32.mrf.mxu2  ;;  %v616_v25 = vpop.f32.mrf.mxu3 }
  0xd5   : > { %5073 = vst [vmem:[#allocation11_spill] sm:$0xff] %v3796_v20  ;;  %v1689_v34 = vrot.slane %v616_v25, 2 }
  0xdb   : > { %v3806_v30 = vpop.f32.mrf.mxu0  ;;  %v3808_v33 = vpop.f32.mrf.mxu1 }
  0xdc   : > { %v3804_v27 = vpop.f32.mrf.mxu2  ;;  %v618_v35 = vpop.f32.mrf.mxu3 }
  0xdd   : > { %5074 = vst [vmem:[#allocation12_spill] sm:$0xff] %v3804_v27  ;;  %v1690_v6 = vrot.slane %v618_v35, 2 }
  0xde   : > { %3292 = vmatmul.msk.bf16.gmra.mxu1 %vm197_vm1, %v3628_v15  ;;  %3355 = vmatmul.msk.bf16.gmra.mxu0 %vm197_vm1, %v3628_v15 }
  0xdf   : > { %v1691_v36 = vsel %vm1509_vm2, %v1689_v34, %v1690_v6 }
  0xe0   : > { %3337 = vmatmul.msk.bf16.gmra.mxu3 %vm197_vm1, %v3680_v31 }
  0xe1   : > { %3313 = vmatmul.msk.bf16.gmra.mxu2 %vm197_vm1, %v3628_v15 }
  0xe3   : > { %v3821_v38 = vpop.f32.mrf.mxu0  ;;  %v3823_v39 = vpop.f32.mrf.mxu1 }
  0xe4   : > { %v3817_v37 = vpop.f32.mrf.mxu2  ;;  %v621_v42 = vpop.f32.mrf.mxu3 }
  0xe5   : > { %5075 = vst [vmem:[#allocation13_spill] sm:$0xff] %v3817_v37  ;;  %v1692_v43 = vrot.slane %v621_v42, 2 }
  0xe7   : > { %v1693_v49 = vsel %vm1509_vm2, %v1690_v6, %v1692_v43 }
  0xeb   : > { %v397_v57 = vpop.f32.mrf.mxu1  ;;  %v721_v15 = vpop.f32.mrf.mxu0 }
  0xec   : > { %v3826_v53 = vpop.f32.mrf.mxu2  ;;  %v623_v61 = vpop.f32.mrf.mxu3  ;;  %v1330_v11 = vrot.slane %v397_v57, 1 }
  0xed   : > { %5076 = vst [vmem:[#allocation14_spill] sm:$0xff] %v3826_v53  ;;  %v1694_v1 = vrot.slane %v623_v61, 2 }
  0xee   : > { %3293 = vmatmul.msk.bf16.gmra.mxu1 %vm197_vm1, %v3649_v22  ;;  %3356 = vmatmul.msk.bf16.gmra.mxu0 %vm197_vm1, %v3649_v22 }
  0xef   : > { %v3835_v5 = vsel %vm1509_vm2, %v1692_v43, %v1694_v1 }
  0xf0   : > { %3338 = vmatmul.msk.bf16.gmra.mxu3 %vm197_vm1, %v3696_v40 }
  0xf1   : > { %3314 = vmatmul.msk.bf16.gmra.mxu2 %vm197_vm1, %v3649_v22 }
  0xf3   : > { %v399_v25 = vpop.f32.mrf.mxu1  ;;  %v722_v34 = vpop.f32.mrf.mxu0 }
  0xf4   : > { %v505_v19 = vpop.f32.mrf.mxu2  ;;  %v1331_v35 = vrot.slane %v399_v25, 1  ;;  %v626_v6 = vpop.f32.mrf.mxu3 }
  0xf5   : > { %v1696_v15 = vrot.slane %v626_v6, 2  ;;  %v1510_v37 = vrot.slane %v505_v19, 2 }
  0xf6   : > { %v1332_v42 = vsel %vm1329_vm3, %v1330_v11, %v1331_v35 }
  0xf7   : > { %v3841_v61 = vsel %vm1509_vm2, %v1694_v1, %v1696_v15  ;;  %v1437_v27 = vadd.f32 %v1332_v42, %v3719_v44 }
  0xfb   : > { %v402_v53 = vpop.f32.mrf.mxu1  ;;  %v724_v57 = vpop.f32.mrf.mxu0 }
  0xfc   : > { %v507_v22 = vpop.f32.mrf.mxu2  ;;  %v1333_v20 = vrot.slane %v402_v53, 1  ;;  %v628_v7 = vpop.f32.mrf.mxu3  ;;  %v1870_v53 = vrot.slane %v724_v57, 3 }
  0xfd   : > { %v1511_v43 = vrot.slane %v507_v22, 2  ;;  %v1698_v1 = vrot.slane %v628_v7, 2 }
  0xfe   : > { %v1334_v25 = vsel %vm1329_vm3, %v1331_v35, %v1333_v20  ;;  %3294 = vmatmul.msk.bf16.gmra.mxu1 %vm197_vm1, %v3666_v28  ;;  %3357 = vmatmul.msk.bf16.gmra.mxu0 %vm197_vm1, %v3666_v28 }
  0xff   : > { %v1512_v12 = vsel %vm1509_vm2, %v1510_v37, %v1511_v43  ;;  %v3853_v44 = vsel %vm1509_vm2, %v1696_v15, %v1698_v1  ;;  %v1438_v35 = vadd.f32 %v1334_v25, %v3729_v47 }
 0x100   : > { %v1617_v34 = vadd.f32 %v1512_v12, %v1437_v27  ;;  %3339 = vmatmul.msk.bf16.gmra.mxu3 %vm197_vm1, %v3611_v9 }
 0x101   : > { %3315 = vmatmul.msk.bf16.gmra.mxu2 %vm197_vm1, %v3666_v28 }
 0x102   : > { %v1796_v11 = vadd.f32 %v1691_v36, %v1617_v34 }
 0x103   : > { %v404_v27 = vpop.f32.mrf.mxu1  ;;  %v726_v19 = vpop.f32.mrf.mxu0 }
 0x104   : > { %v510_v37 = vpop.f32.mrf.mxu2  ;;  %v1335_v6 = vrot.slane %v404_v27, 1  ;;  %v1871_v7 = vrot.slane %v726_v19, 3  ;;  %v631_v28 = vpop.f32.mrf.mxu3 }
 0x105   : > { %v1513_v12 = vrot.slane %v510_v37, 2  ;;  %v1700_v57 = vrot.slane %v631_v28, 2 }
 0x106   : > { %v1336_v15 = vsel %vm1329_vm3, %v1333_v20, %v1335_v6  ;;  %v1872_v22 = vsel %vm1869_vm4, %v1870_v53, %v1871_v7 }
 0x107   : > { %v1514_v42 = vsel %vm1509_vm2, %v1511_v43, %v1513_v12  ;;  %v3861_v34 = vadd.f32 %v1872_v22, %v1796_v11  ;;  %v3864_v37 = vsel %vm1509_vm2, %v1698_v1, %v1700_v57  ;;  %v1439_v27 = vadd.f32 %v1336_v15, %v3735_v51 }
 0x108   : > { %v1618_v36 = vadd.f32 %v1514_v42, %v1438_v35 }
 0x10a   : > { %v1797_v2 = vadd.f32 %v1693_v49, %v1618_v36 }
 0x10b   : > { %v407_v47 = vpop.f32.mrf.mxu1  ;;  %v729_v25 = vpop.f32.mrf.mxu0 }
 0x10c   : > { %v512_v62 = vpop.f32.mrf.mxu2  ;;  %v1337_v43 = vrot.slane %v407_v47, 1  ;;  %v1873_v19 = vrot.slane %v729_v25, 3  ;;  %v633_v20 = vpop.f32.mrf.mxu3 }
 0x10d   : > { %v1515_v58 = vrot.slane %v512_v62, 2  ;;  %v1702_v62 = vrot.slane %v633_v20, 2 }
 0x10e   : > { %v1338_v53 = vsel %vm1329_vm3, %v1335_v6, %v1337_v43  ;;  %v1874_v11 = vsel %vm1869_vm4, %v1871_v7, %v1873_v19  ;;  %3295 = vmatmul.msk.bf16.gmra.mxu1 %vm197_vm1, %v3680_v31  ;;  %3358 = vmatmul.msk.bf16.gmra.mxu0 %vm197_vm1, %v3680_v31 }
 0x10f   : > { %v1516_v35 = vsel %vm1509_vm2, %v1513_v12, %v1515_v58  ;;  %v3874_v49 = vadd.f32 %v1874_v11, %v1797_v2  ;;  %v3880_v1 = vsel %vm1509_vm2, %v1700_v57, %v1702_v62  ;;  %v1440_v36 = vadd.f32 %v1338_v53, %v3746_v55 }
 0x110   : > { %v1619_v42 = vadd.f32 %v1516_v35, %v1439_v27  ;;  %3340 = vmatmul.msk.bf16.gmra.mxu3 %vm197_vm1, %v3631_v16 }
 0x111   : > { %3316 = vmatmul.msk.bf16.gmra.mxu2 %vm197_vm1, %v3680_v31 }
 0x112   : > { %v1798_v51 = vadd.f32 %v3835_v5, %v1619_v42 }
 0x113   : > { %v409_v7 = vpop.f32.mrf.mxu1  ;;  %v731_v28 = vpop.f32.mrf.mxu0 }
 0x114   : > { %v515_v12 = vpop.f32.mrf.mxu2  ;;  %v1339_v15 = vrot.slane %v409_v7, 1  ;;  %v1875_v2 = vrot.slane %v731_v28, 3  ;;  %v636_v47 = vpop.f32.mrf.mxu3 }
 0x115   : > { %v1517_v6 = vrot.slane %v515_v12, 2  ;;  %v1704_v25 = vrot.slane %v636_v47, 2 }
 0x116   : > { %v1340_v5 = vsel %vm1329_vm3, %v1337_v43, %v1339_v15  ;;  %v1876_v57 = vsel %vm1869_vm4, %v1873_v19, %v1875_v2 }
 0x117   : > { %v1518_v22 = vsel %vm1509_vm2, %v1515_v58, %v1517_v6  ;;  %v3888_v27 = vadd.f32 %v1876_v57, %v1798_v51  ;;  %v3892_v20 = vsel %vm1509_vm2, %v1702_v62, %v1704_v25  ;;  %v1441_v58 = vadd.f32 %v1340_v5, %v3752_v59 }
 0x118   : > { %v1620_v31 = vadd.f32 %v1518_v22, %v1440_v36 }
 0x11a   : > { %v1799_v35 = vadd.f32 %v3841_v61, %v1620_v31 }
 0x11b   : > { %v412_v53 = vpop.f32.mrf.mxu1  ;;  %v734_v11 = vpop.f32.mrf.mxu0 }
 0x11c   : > { %v517_v42 = vpop.f32.mrf.mxu2  ;;  %v1341_v12 = vrot.slane %v412_v53, 1  ;;  %v1877_v7 = vrot.slane %v734_v11, 3  ;;  %v638_v28 = vpop.f32.mrf.mxu3 }
 0x11d   : > { %v1519_v55 = vrot.slane %v517_v42, 2  ;;  %v1706_v61 = vrot.slane %v638_v28, 2 }
 0x11e   : > { %v1342_v51 = vsel %vm1329_vm3, %v1339_v15, %v1341_v12  ;;  %v1878_v36 = vsel %vm1869_vm4, %v1875_v2, %v1877_v7  ;;  %3296 = vmatmul.msk.bf16.gmra.mxu1 %vm197_vm1, %v3696_v40  ;;  %3359 = vmatmul.msk.bf16.gmra.mxu0 %vm197_vm1, %v3696_v40 }
 0x11f   : > { %v1520_v43 = vsel %vm1509_vm2, %v1517_v6, %v1519_v55  ;;  %v3902_v62 = vadd.f32 %v1878_v36, %v1799_v35  ;;  %v3908_v6 = vsel %vm1509_vm2, %v1704_v25, %v1706_v61  ;;  %v1442_v31 = vadd.f32 %v1342_v51, %v3763_v63 }
 0x120   : > { %v1621_v19 = vadd.f32 %v1520_v43, %v1441_v58  ;;  %3341 = vmatmul.msk.bf16.gmra.mxu3 %vm197_vm1, %v3652_v23 }
 0x121   : > { %3317 = vmatmul.msk.bf16.gmra.mxu2 %vm197_vm1, %v3696_v40 }
 0x122   : > { %v1800_v59 = vadd.f32 %v3853_v44, %v1621_v19 }
 0x123   : > { %v414_v22 = vpop.f32.mrf.mxu1  ;;  %v736_v47 = vpop.f32.mrf.mxu0 }
 0x124   : > { %v520_v15 = vpop.f32.mrf.mxu2  ;;  %v1343_v5 = vrot.slane %v414_v22, 1  ;;  %v1879_v57 = vrot.slane %v736_v47, 3  ;;  %v641_v42 = vpop.f32.mrf.mxu3 }
 0x125   : > { %v1521_v2 = vrot.slane %v520_v15, 2  ;;  %v1708_v53 = vrot.slane %v641_v42, 2 }
 0x126   : > { %v1344_v44 = vsel %vm1329_vm3, %v1341_v12, %v1343_v5  ;;  %v1880_v25 = vsel %vm1869_vm4, %v1877_v7, %v1879_v57 }
 0x127   : > { %v1522_v35 = vsel %vm1509_vm2, %v1519_v55, %v1521_v2  ;;  %v3916_v11 = vadd.f32 %v1880_v25, %v1800_v59  ;;  %v3920_v43 = vsel %vm1509_vm2, %v1706_v61, %v1708_v53  ;;  %v1443_v55 = vadd.f32 %v1344_v44, %v3769_v3 }
 0x128   : > { %v1622_v40 = vadd.f32 %v1522_v35, %v1442_v31 }
 0x12a   : > { %v1801_v58 = vadd.f32 %v3864_v37, %v1622_v40 }
 0x12b   : > { %v417_v19 = vpop.f32.mrf.mxu1  ;;  %v739_v51 = vpop.f32.mrf.mxu0 }
 0x12c   : > { %v522_v28 = vpop.f32.mrf.mxu2  ;;  %v1345_v36 = vrot.slane %v417_v19, 1  ;;  %v1881_v15 = vrot.slane %v739_v51, 3  ;;  %v643_v22 = vpop.f32.mrf.mxu3 }
 0x12d   : > { %v1523_v63 = vrot.slane %v522_v28, 2  ;;  %v1710_v37 = vrot.slane %v643_v22, 2 }
 0x12e   : > { %v1346_v59 = vsel %vm1329_vm3, %v1343_v5, %v1345_v36  ;;  %v1882_v47 = vsel %vm1869_vm4, %v1879_v57, %v1881_v15  ;;  %3297 = vmatmul.msk.bf16.gmra.mxu1 %vm197_vm1, %v3611_v9  ;;  %3360 = vmatmul.msk.bf16.gmra.mxu0 %vm197_vm1, %v3611_v9 }
 0x12f   : > { %v1524_v12 = vsel %vm1509_vm2, %v1521_v2, %v1523_v63  ;;  %v3930_v61 = vadd.f32 %v1882_v47, %v1801_v58  ;;  %v3936_v2 = vsel %vm1509_vm2, %v1708_v53, %v1710_v37  ;;  %v1444_v42 = vadd.f32 %v1346_v59, %v3780_v8 }
 0x130   : > { %v1623_v7 = vadd.f32 %v1524_v12, %v1443_v55  ;;  %3342 = vmatmul.msk.bf16.gmra.mxu3 %vm197_vm1, %v3669_v29 }
 0x131   : > { %3318 = vmatmul.msk.bf16.gmra.mxu2 %vm197_vm1, %v3611_v9 }
 0x132   : > { %v1802_v3 = vadd.f32 %v3880_v1, %v1623_v7 }
 0x133   : > { %v419_v57 = vpop.f32.mrf.mxu1  ;;  %v741_v35 = vpop.f32.mrf.mxu0 }
 0x134   : > { %v525_v31 = vpop.f32.mrf.mxu2  ;;  %v1347_v40 = vrot.slane %v419_v57, 1  ;;  %v1883_v44 = vrot.slane %v741_v35, 3  ;;  %v646_v58 = vpop.f32.mrf.mxu3 }
 0x135   : > { %v1525_v5 = vrot.slane %v525_v31, 2  ;;  %v1712_v28 = vrot.slane %v646_v58, 2 }
 0x136   : > { %v1348_v1 = vsel %vm1329_vm3, %v1345_v36, %v1347_v40  ;;  %v1884_v53 = vsel %vm1869_vm4, %v1881_v15, %v1883_v44 }
 0x137   : > { %v1526_v25 = vsel %vm1509_vm2, %v1523_v63, %v1525_v5  ;;  %v3944_v19 = vadd.f32 %v1884_v53, %v1802_v3  ;;  %v3948_v55 = vsel %vm1509_vm2, %v1710_v37, %v1712_v28  ;;  %v1445_v63 = vadd.f32 %v1348_v1, %v3786_v14 }
 0x138   : > { %v1624_v9 = vadd.f32 %v1526_v25, %v1444_v42 }
 0x13a   : > { %v1803_v51 = vadd.f32 %v3892_v20, %v1624_v9 }
 0x13b   : > { %v422_v22 = vpop.f32.mrf.mxu1  ;;  %v744_v7 = vpop.f32.mrf.mxu0 }
 0x13c   : > { %v527_v12 = vpop.f32.mrf.mxu2  ;;  %v1349_v59 = vrot.slane %v422_v22, 1  ;;  %v1885_v47 = vrot.slane %v744_v7, 3  ;;  %v648_v31 = vpop.f32.mrf.mxu3 }
 0x13d   : > { %v1527_v8 = vrot.slane %v527_v12, 2  ;;  %v1714_v20 = vrot.slane %v648_v31, 2 }
 0x13e   : > { %v1350_v3 = vsel %vm1329_vm3, %v1347_v40, %v1349_v59  ;;  %v1886_v57 = vsel %vm1869_vm4, %v1883_v44, %v1885_v47  ;;  %3298 = vmatmul.msk.bf16.gmra.mxu1 %vm197_vm1, %v3631_v16  ;;  %3361 = vmatmul.msk.bf16.gmra.mxu0 %vm197_vm1, %v3631_v16 }
 0x13f   : > { %v1528_v36 = vsel %vm1509_vm2, %v1525_v5, %v1527_v8  ;;  %v3958_v37 = vadd.f32 %v1886_v57, %v1803_v51  ;;  %v3964_v5 = vsel %vm1509_vm2, %v1712_v28, %v1714_v20  ;;  %v1446_v25 = vadd.f32 %v1350_v3, %v3800_v21 }
 0x140   : > { %v1625_v15 = vadd.f32 %v1528_v36, %v1445_v63  ;;  %3343 = vmatmul.msk.bf16.gmra.mxu3 %vm197_vm1, %v3683_v32 }
 0x141   : > { %3319 = vmatmul.msk.bf16.gmra.mxu2 %vm197_vm1, %v3631_v16 }
 0x142   : > { %v1804_v14 = vadd.f32 %v3908_v6, %v1625_v15 }
 0x143   : > { %v424_v40 = vpop.f32.mrf.mxu1  ;;  %v746_v44 = vpop.f32.mrf.mxu0 }
 0x144   : > { %v530_v35 = vpop.f32.mrf.mxu2  ;;  %v1351_v58 = vrot.slane %v424_v40, 1  ;;  %v1887_v9 = vrot.slane %v746_v44, 3  ;;  %v651_v53 = vpop.f32.mrf.mxu3 }
 0x145   : > { %v1529_v42 = vrot.slane %v530_v35, 2  ;;  %v1716_v51 = vrot.slane %v651_v53, 2 }
 0x146   : > { %v1352_v6 = vsel %vm1329_vm3, %v1349_v59, %v1351_v58  ;;  %v1888_v28 = vsel %vm1869_vm4, %v1885_v47, %v1887_v9 }
 0x147   : > { %v1530_v1 = vsel %vm1509_vm2, %v1527_v8, %v1529_v42  ;;  %v3972_v12 = vadd.f32 %v1888_v28, %v1804_v14  ;;  %v3976_v7 = vsel %vm1509_vm2, %v1714_v20, %v1716_v51  ;;  %v1447_v8 = vadd.f32 %v1352_v6, %v3806_v30 }
 0x148   : > { %v1626_v16 = vadd.f32 %v1530_v1, %v1446_v25 }
 0x14a   : > { %v1805_v22 = vadd.f32 %v3920_v43, %v1626_v16 }
 0x14b   : > { %v427_v36 = vpop.f32.mrf.mxu1  ;;  %v749_v31 = vpop.f32.mrf.mxu0 }
 0x14c   : > { %v532_v63 = vpop.f32.mrf.mxu2  ;;  %v1353_v15 = vrot.slane %v427_v36, 1  ;;  %v1889_v3 = vrot.slane %v749_v31, 3  ;;  %v653_v57 = vpop.f32.mrf.mxu3 }
 0x14d   : > { %v1531_v21 = vrot.slane %v532_v63, 2  ;;  %v1718_v43 = vrot.slane %v653_v57, 2 }
 0x14e   : > { %v1354_v14 = vsel %vm1329_vm3, %v1351_v58, %v1353_v15  ;;  %v1890_v35 = vsel %vm1869_vm4, %v1887_v9, %v1889_v3  ;;  %3299 = vmatmul.msk.bf16.gmra.mxu1 %vm197_vm1, %v3652_v23  ;;  %3362 = vmatmul.msk.bf16.gmra.mxu0 %vm197_vm1, %v3652_v23 }
 0x14f   : > { %v1532_v59 = vsel %vm1509_vm2, %v1529_v42, %v1531_v21  ;;  %v3986_v20 = vadd.f32 %v1890_v35, %v1805_v22  ;;  %v3992_v42 = vsel %vm1509_vm2, %v1716_v51, %v1718_v43  ;;  %v1448_v9 = vadd.f32 %v1354_v14, %v3821_v38 }
 0x150   : > { %v1627_v47 = vadd.f32 %v1532_v59, %v1447_v8  ;;  %3344 = vmatmul.msk.bf16.gmra.mxu3 %vm197_vm1, %v3699_v41 }
 0x151   : > { %3320 = vmatmul.msk.bf16.gmra.mxu2 %vm197_vm1, %v3652_v23 }
 0x152   : > { %v1806_v30 = vadd.f32 %v3936_v2, %v1627_v47 }
 0x153   : > { %v429_v25 = vpop.f32.mrf.mxu1  ;;  %v751_v58 = vpop.f32.mrf.mxu0 }
 0x154   : > { %v535_v40 = vpop.f32.mrf.mxu2  ;;  %v1355_v1 = vrot.slane %v429_v25, 1  ;;  %v1891_v53 = vrot.slane %v751_v58, 3  ;;  %v656_v6 = vpop.f32.mrf.mxu3 }
 0x155   : > { %v1533_v44 = vrot.slane %v535_v40, 2  ;;  %v1720_v51 = vrot.slane %v656_v6, 2 }
 0x156   : > { %v1356_v2 = vsel %vm1329_vm3, %v1353_v15, %v1355_v1  ;;  %v1892_v28 = vsel %vm1869_vm4, %v1889_v3, %v1891_v53 }
 0x157   : > { %v1534_v16 = vsel %vm1509_vm2, %v1531_v21, %v1533_v44  ;;  %v4000_v22 = vadd.f32 %v1892_v28, %v1806_v30  ;;  %v4004_v36 = vsel %vm1509_vm2, %v1718_v43, %v1720_v51  ;;  %v1449_v21 = vadd.f32 %v1356_v2, %v3721_v45 }
 0x158   : > { %v1628_v23 = vadd.f32 %v1534_v16, %v1448_v9 }
 0x15a   : > { %v1807_v63 = vadd.f32 %v3948_v55, %v1628_v23 }
 0x15b   : > { %v432_v8 = vpop.f32.mrf.mxu1  ;;  %v754_v59 = vpop.f32.mrf.mxu0 }
 0x15c   : > { %v537_v31 = vpop.f32.mrf.mxu2  ;;  %v1357_v57 = vrot.slane %v432_v8, 1  ;;  %v1893_v47 = vrot.slane %v754_v59, 3  ;;  %v658_v14 = vpop.f32.mrf.mxu3 }
 0x15d   : > { %v1535_v38 = vrot.slane %v537_v31, 2  ;;  %v1722_v55 = vrot.slane %v658_v14, 2 }
 0x15e   : > { %v1358_v35 = vsel %vm1329_vm3, %v1355_v1, %v1357_v57  ;;  %v1894_v30 = vsel %vm1869_vm4, %v1891_v53, %v1893_v47  ;;  %3300 = vmatmul.msk.bf16.gmra.mxu1 %vm197_vm1, %v3669_v29  ;;  %3363 = vmatmul.msk.bf16.gmra.mxu0 %vm197_vm1, %v3669_v29 }
 0x15f   : > { %v1536_v15 = vsel %vm1509_vm2, %v1533_v44, %v1535_v38  ;;  %v4014_v43 = vadd.f32 %v1894_v30, %v1807_v63  ;;  %v4020_v40 = vsel %vm1509_vm2, %v1720_v51, %v1722_v55  ;;  %v1450_v1 = vadd.f32 %v1358_v35, %v3731_v48 }
 0x160   : > { %v1629_v3 = vadd.f32 %v1536_v15, %v1449_v21  ;;  %3345 = vmatmul.msk.bf16.gmra.mxu3 %vm197_vm1, %v3622_v13 }
 0x161   : > { %3321 = vmatmul.msk.bf16.gmra.mxu2 %vm197_vm1, %v3669_v29 }
 0x162   : > { %v1808_v45 = vadd.f32 %v3964_v5, %v1629_v3 }
 0x163   : > { %v434_v58 = vpop.f32.mrf.mxu1  ;;  %v756_v9 = vpop.f32.mrf.mxu0 }
 0x164   : > { %v540_v44 = vpop.f32.mrf.mxu2  ;;  %v1359_v53 = vrot.slane %v434_v58, 1  ;;  %v1895_v16 = vrot.slane %v756_v9, 3  ;;  %v661_v23 = vpop.f32.mrf.mxu3 }
 0x165   : > { %v1537_v25 = vrot.slane %v540_v44, 2  ;;  %v1724_v28 = vrot.slane %v661_v23, 2 }
 0x166   : > { %v1360_v5 = vsel %vm1329_vm3, %v1357_v57, %v1359_v53  ;;  %v1896_v2 = vsel %vm1869_vm4, %v1893_v47, %v1895_v16 }
 0x167   : > { %v1538_v6 = vsel %vm1509_vm2, %v1535_v38, %v1537_v25  ;;  %v4028_v51 = vadd.f32 %v1896_v2, %v1808_v45  ;;  %v4032_v31 = vsel %vm1509_vm2, %v1722_v55, %v1724_v28  ;;  %v1451_v38 = vadd.f32 %v1360_v5, %v3737_v52 }
 0x168   : > { %v1630_v29 = vadd.f32 %v1538_v6, %v1450_v1 }
 0x16a   : > { %v1809_v63 = vadd.f32 %v3976_v7, %v1630_v29 }
 0x16b   : > { %v437_v59 = vpop.f32.mrf.mxu1  ;;  %v759_v21 = vpop.f32.mrf.mxu0 }
 0x16c   : > { %v542_v8 = vpop.f32.mrf.mxu2  ;;  %v1361_v15 = vrot.slane %v437_v59, 1  ;;  %v1897_v14 = vrot.slane %v759_v21, 3  ;;  %v663_v3 = vpop.f32.mrf.mxu3 }
 0x16d   : > { %v1539_v48 = vrot.slane %v542_v8, 2  ;;  %v1726_v7 = vrot.slane %v663_v3, 2 }
 0x16e   : > { %v1362_v35 = vsel %vm1329_vm3, %v1359_v53, %v1361_v15  ;;  %v1898_v30 = vsel %vm1869_vm4, %v1895_v16, %v1897_v14  ;;  %3301 = vmatmul.msk.bf16.gmra.mxu1 %vm197_vm1, %v3683_v32  ;;  %3364 = vmatmul.msk.bf16.gmra.mxu0 %vm197_vm1, %v3683_v32 }
 0x16f   : > { %v1540_v57 = vsel %vm1509_vm2, %v1537_v25, %v1539_v48  ;;  %v4042_v55 = vadd.f32 %v1898_v30, %v1809_v63  ;;  %v4048_v45 = vsel %vm1509_vm2, %v1724_v28, %v1726_v7  ;;  %v1452_v1 = vadd.f32 %v1362_v35, %v3748_v56 }
 0x170   : > { %v1631_v47 = vadd.f32 %v1540_v57, %v1451_v38  ;;  %3346 = vmatmul.msk.bf16.gmra.mxu3 %vm197_vm1, %v3639_v17 }
 0x171   : > { %3322 = vmatmul.msk.bf16.gmra.mxu2 %vm197_vm1, %v3683_v32 }
 0x172   : > { %v1810_v52 = vadd.f32 %v3992_v42, %v1631_v47 }
 0x173   : > { %v439_v58 = vpop.f32.mrf.mxu1  ;;  %v761_v9 = vpop.f32.mrf.mxu0 }
 0x174   : > { %v545_v44 = vpop.f32.mrf.mxu2  ;;  %v1363_v53 = vrot.slane %v439_v58, 1  ;;  %v1899_v16 = vrot.slane %v761_v9, 3  ;;  %v666_v23 = vpop.f32.mrf.mxu3 }
 0x175   : > { %v1541_v25 = vrot.slane %v545_v44, 2  ;;  %v1728_v5 = vrot.slane %v666_v23, 2 }
 0x176   : > { %v1364_v42 = vsel %vm1329_vm3, %v1361_v15, %v1363_v53  ;;  %v1900_v29 = vsel %vm1869_vm4, %v1897_v14, %v1899_v16 }
 0x177   : > { %v1542_v6 = vsel %vm1509_vm2, %v1539_v48, %v1541_v25  ;;  %v4056_v2 = vadd.f32 %v1900_v29, %v1810_v52  ;;  %v4060_v28 = vsel %vm1509_vm2, %v1726_v7, %v1728_v5  ;;  %v1453_v48 = vadd.f32 %v1364_v42, %v3754_v60 }
 0x178   : > { %v1632_v32 = vadd.f32 %v1542_v6, %v1452_v1 }
 0x17a   : > { %v1811_v17 = vadd.f32 %v4004_v36, %v1632_v32 }
 0x17b   : > { %v442_v8 = vpop.f32.mrf.mxu1  ;;  %v764_v59 = vpop.f32.mrf.mxu0 }
 0x17c   : > { %v547_v63 = vpop.f32.mrf.mxu2  ;;  %v1365_v21 = vrot.slane %v442_v8, 1  ;;  %v1901_v38 = vrot.slane %v764_v59, 3  ;;  %v668_v57 = vpop.f32.mrf.mxu3 }
 0x17d   : > { %v1543_v56 = vrot.slane %v547_v63, 2  ;;  %v1730_v36 = vrot.slane %v668_v57, 2 }
 0x17e   : > { %v1366_v3 = vsel %vm1329_vm3, %v1363_v53, %v1365_v21  ;;  %v1902_v47 = vsel %vm1869_vm4, %v1899_v16, %v1901_v38  ;;  %3302 = vmatmul.msk.bf16.gmra.mxu1 %vm197_vm1, %v3699_v41  ;;  %3365 = vmatmul.msk.bf16.gmra.mxu0 %vm197_vm1, %v3699_v41 }
 0x17f   : > { %v1544_v15 = vsel %vm1509_vm2, %v1541_v25, %v1543_v56  ;;  %v4070_v35 = vadd.f32 %v1902_v47, %v1811_v17  ;;  %v4076_v30 = vsel %vm1509_vm2, %v1728_v5, %v1730_v36  ;;  %v1454_v58 = vadd.f32 %v1366_v3, %v3765_v0 }
 0x180   : > { %v1633_v14 = vadd.f32 %v1544_v15, %v1453_v48  ;;  %3347 = vmatmul.msk.bf16.gmra.mxu3 %vm197_vm1, %v3660_v26 }
 0x181   : > { %3323 = vmatmul.msk.bf16.gmra.mxu2 %vm197_vm1, %v3699_v41 }
 0x182   : > { %v1812_v60 = vadd.f32 %v4020_v40, %v1633_v14 }
 0x183   : > { %v444_v44 = vpop.f32.mrf.mxu1  ;;  %v766_v25 = vpop.f32.mrf.mxu0 }
 0x184   : > { %v550_v7 = vpop.f32.mrf.mxu2  ;;  %v1367_v9 = vrot.slane %v444_v44, 1  ;;  %v1903_v1 = vrot.slane %v766_v25, 3  ;;  %v671_v16 = vpop.f32.mrf.mxu3 }
 0x185   : > { %v1545_v52 = vrot.slane %v550_v7, 2  ;;  %v1732_v23 = vrot.slane %v671_v16, 2 }
 0x186   : > { %v1368_v40 = vsel %vm1329_vm3, %v1365_v21, %v1367_v9  ;;  %v1904_v6 = vsel %vm1869_vm4, %v1901_v38, %v1903_v1 }
 0x187   : > { %v1546_v53 = vsel %vm1509_vm2, %v1543_v56, %v1545_v52  ;;  %v4084_v32 = vadd.f32 %v1904_v6, %v1812_v60  ;;  %v4088_v29 = vsel %vm1509_vm2, %v1730_v36, %v1732_v23  ;;  %v1455_v56 = vadd.f32 %v1368_v40, %v3771_v4  ;;  %v4107_v36 = vld [vmem:[%s3600_s29] sm:$0xff] }
 0x188   : > { %v1634_v41 = vadd.f32 %v1546_v53, %v1454_v58 }
 0x18a   : > { %v1813_v42 = vadd.f32 %v4032_v31, %v1634_v41 }
 0x18b   : > { %v447_v17 = vpop.f32.mrf.mxu1  ;;  %v769_v63 = vpop.f32.mrf.mxu0 }
 0x18c   : > { %v552_v5 = vpop.f32.mrf.mxu2  ;;  %v1369_v8 = vrot.slane %v447_v17, 1  ;;  %v1905_v59 = vrot.slane %v769_v63, 3  ;;  %v673_v21 = vpop.f32.mrf.mxu3 }
 0x18d   : > { %v1547_v0 = vrot.slane %v552_v5, 2  ;;  %v1734_v57 = vrot.slane %v673_v21, 2  ;;  %v3492_v21 = vld [vmem:[%s3600_s29 + $0x98] sm:$0xff] }
 0x18e   : > { %v1370_v15 = vsel %vm1329_vm3, %v1367_v9, %v1369_v8  ;;  %v1906_v31 = vsel %vm1869_vm4, %v1903_v1, %v1905_v59  ;;  %3303 = vmatmul.msk.bf16.gmra.mxu1 %vm197_vm1, %v3622_v13  ;;  %3366 = vmatmul.msk.bf16.gmra.mxu0 %vm197_vm1, %v3622_v13 }
 0x18f   : > { %v1548_v48 = vsel %vm1509_vm2, %v1545_v52, %v1547_v0  ;;  %v4098_v14 = vadd.f32 %v1906_v31, %v1813_v42  ;;  %v4104_v3 = vsel %vm1509_vm2, %v1732_v23, %v1734_v57  ;;  %v1456_v44 = vadd.f32 %v1370_v15, %v3782_v10 }
 0x190   : > { %v1635_v38 = vadd.f32 %v1548_v48, %v1455_v56  ;;  %3411 = vmatmul.msk.bf16.vlgmr.msra.gmra.mxu3 %vm197_vm1, %v4107_v36 }
 0x191   : > { %3324 = vmatmul.msk.bf16.gmra.mxu2 %vm197_vm1, %v3622_v13 }
 0x192   : > { %v1814_v4 = vadd.f32 %v4048_v45, %v1635_v38 }
 0x193   : > { %v449_v7 = vpop.f32.mrf.mxu1  ;;  %v771_v52 = vpop.f32.mrf.mxu0 }
 0x194   : > { %v555_v47 = vpop.f32.mrf.mxu2  ;;  %v1371_v25 = vrot.slane %v449_v7, 1  ;;  %v1907_v58 = vrot.slane %v771_v52, 3  ;;  %v676_v9 = vpop.f32.mrf.mxu3 }
 0x195   : > { %v1549_v60 = vrot.slane %v555_v47, 2  ;;  %v1736_v16 = vrot.slane %v676_v9, 2 }
 0x196   : > { %v1372_v1 = vsel %vm1329_vm3, %v1369_v8, %v1371_v25  ;;  %v1908_v53 = vsel %vm1869_vm4, %v1905_v59, %v1907_v58 }
 0x197   : > { %v1550_v13 = vsel %vm1509_vm2, %v1547_v0, %v1549_v60  ;;  %v4115_v41 = vadd.f32 %v1908_v53, %v1814_v4  ;;  %v4119_v6 = vsel %vm1509_vm2, %v1734_v57, %v1736_v16  ;;  %v1457_v0 = vadd.f32 %v1372_v1, %v3788_v18  ;;  %v4136_v4 = vld [vmem:[%s3600_s29 + $0x8] sm:$0xff] }
 0x198   : > { %v1636_v45 = vadd.f32 %v1550_v13, %v1456_v44 }
 0x19a   : > { %v1815_v40 = vadd.f32 %v4060_v28, %v1636_v45 }
 0x19b   : > { %v452_v42 = vpop.f32.mrf.mxu1  ;;  %v774_v5 = vpop.f32.mrf.mxu0 }
 0x19c   : > { %v557_v10 = vpop.f32.mrf.mxu2  ;;  %v1373_v17 = vrot.slane %v452_v42, 1  ;;  %v1909_v63 = vrot.slane %v774_v5, 3  ;;  %v678_v8 = vpop.f32.mrf.mxu3 }
 0x19d   : > { %v1551_v23 = vrot.slane %v557_v10, 2  ;;  %v1738_v38 = vrot.slane %v678_v8, 2 }
 0x19e   : > { %v1374_v48 = vsel %vm1329_vm3, %v1371_v25, %v1373_v17  ;;  %v1910_v28 = vsel %vm1869_vm4, %v1907_v58, %v1909_v63  ;;  %3304 = vmatmul.msk.bf16.gmra.mxu1 %vm197_vm1, %v3492_v21  ;;  %3367 = vmatmul.msk.bf16.gmra.mxu0 %vm197_vm1, %v3492_v21 }
 0x19f   : > { %v1552_v56 = vsel %vm1509_vm2, %v1549_v60, %v1551_v23  ;;  %v4128_v15 = vadd.f32 %v1910_v28, %v1815_v40  ;;  %v4133_v31 = vsel %vm1509_vm2, %v1736_v16, %v1738_v38  ;;  %v1458_v52 = vadd.f32 %v1374_v48, %v3802_v24 }
 0x1a0   : > { %v1637_v59 = vadd.f32 %v1552_v56, %v1457_v0  ;;  %3412 = vmatmul.msk.bf16.gmra.mxu3 %vm197_vm1, %v4136_v4 }
 0x1a1   : > { %3325 = vmatmul.msk.bf16.gmra.mxu2 %vm197_vm1, %v3492_v21 }
 0x1a2   : > { %v1816_v18 = vadd.f32 %v4076_v30, %v1637_v59 }
 0x1a3   : > { %v454_v60 = vpop.f32.mrf.mxu1  ;;  %v776_v7 = vpop.f32.mrf.mxu0 }
 0x1a4   : > { %v560_v57 = vpop.f32.mrf.mxu2  ;;  %v1375_v44 = vrot.slane %v454_v60, 1  ;;  %v1911_v25 = vrot.slane %v776_v7, 3  ;;  %v681_v13 = vpop.f32.mrf.mxu3 }
 0x1a5   : > { %v1553_v47 = vrot.slane %v560_v57, 2  ;;  %v1740_v1 = vrot.slane %v681_v13, 2 }
 0x1a6   : > { %v1376_v9 = vsel %vm1329_vm3, %v1373_v17, %v1375_v44  ;;  %v1912_v45 = vsel %vm1869_vm4, %v1909_v63, %v1911_v25 }
 0x1a7   : > { %v1554_v58 = vsel %vm1509_vm2, %v1551_v23, %v1553_v47  ;;  %v4144_v53 = vadd.f32 %v1912_v45, %v1816_v18  ;;  %v4148_v40 = vsel %vm1509_vm2, %v1738_v38, %v1740_v1  ;;  %v1459_v23 = vadd.f32 %v1376_v9, %v3808_v33  ;;  %v4167_v18 = vld [vmem:[%s3600_s29 + $0x10] sm:$0xff] }
 0x1a8   : > { %v1638_v30 = vadd.f32 %v1554_v58, %v1458_v52 }
 0x1aa   : > { %v1817_v16 = vadd.f32 %v4088_v29, %v1638_v30 }
 0x1ab   : > { %v457_v42 = vpop.f32.mrf.mxu1  ;;  %v779_v5 = vpop.f32.mrf.mxu0 }
 0x1ac   : > { %v562_v10 = vpop.f32.mrf.mxu2  ;;  %v1377_v0 = vrot.slane %v457_v42, 1  ;;  %v1913_v56 = vrot.slane %v779_v5, 3  ;;  %v683_v63 = vpop.f32.mrf.mxu3 }
 0x1ad   : > { %v1555_v24 = vrot.slane %v562_v10, 2  ;;  %v1742_v48 = vrot.slane %v683_v63, 2 }
 0x1ae   : > { %v1378_v59 = vsel %vm1329_vm3, %v1375_v44, %v1377_v0  ;;  %v1914_v29 = vsel %vm1869_vm4, %v1911_v25, %v1913_v56  ;;  %3305 = vmatmul.msk.bf16.gmra.mxu1 %vm197_vm1, %v3660_v26  ;;  %3368 = vmatmul.msk.bf16.gmra.mxu0 %vm197_vm1, %v3660_v26 }
 0x1af   : > { %v1556_v17 = vsel %vm1509_vm2, %v1553_v47, %v1555_v24  ;;  %v4158_v28 = vadd.f32 %v1914_v29, %v1817_v16  ;;  %v4164_v21 = vsel %vm1509_vm2, %v1740_v1, %v1742_v48  ;;  %v1460_v7 = vadd.f32 %v1378_v59, %v3823_v39 }
 0x1b0   : > { %v1639_v8 = vadd.f32 %v1556_v17, %v1459_v23  ;;  %3413 = vmatmul.msk.bf16.gmra.mxu3 %vm197_vm1, %v4167_v18 }
 0x1b1   : > { %3326 = vmatmul.msk.bf16.gmra.mxu2 %vm197_vm1, %v3660_v26 }
 0x1b2   : > { %v1818_v33 = vadd.f32 %v4104_v3, %v1639_v8 }
 0x1b3   : > { %v459_v47 = vpop.f32.mrf.mxu1  ;;  %v781_v60 = vpop.f32.mrf.mxu0 }
 0x1b4   : > { %v565_v38 = vpop.f32.mrf.mxu2  ;;  %v1379_v52 = vrot.slane %v459_v47, 1  ;;  %v1915_v44 = vrot.slane %v781_v60, 3  ;;  %v686_v58 = vpop.f32.mrf.mxu3 }
 0x1b5   : > { %v1557_v57 = vrot.slane %v565_v38, 2  ;;  %v1744_v9 = vrot.slane %v686_v58, 2  ;;  %v4198_v38 = vld [vmem:[%s3600_s29 + $0x18] sm:$0xff] }
 0x1b6   : > { %v1380_v13 = vsel %vm1329_vm3, %v1377_v0, %v1379_v52  ;;  %v1916_v30 = vsel %vm1869_vm4, %v1913_v56, %v1915_v44 }
 0x1b7   : > { %v1558_v25 = vsel %vm1509_vm2, %v1555_v24, %v1557_v57  ;;  %v4175_v45 = vadd.f32 %v1916_v30, %v1818_v33  ;;  %v4179_v16 = vsel %vm1509_vm2, %v1742_v48, %v1744_v9  ;;  %v1461_v24 = vadd.f32 %v1380_v13, %v3726_v46 }
 0x1b8   : > { %v1640_v3 = vadd.f32 %v1558_v25, %v1460_v7 }
 0x1ba   : > { %v1819_v1 = vadd.f32 %v4119_v6, %v1640_v3 }
 0x1bb   : > { %v462_v42 = vpop.f32.mrf.mxu1  ;;  %v784_v5 = vpop.f32.mrf.mxu0 }
 0x1bc   : > { %v567_v10 = vpop.f32.mrf.mxu2  ;;  %v1381_v23 = vrot.slane %v462_v42, 1  ;;  %v1917_v17 = vrot.slane %v784_v5, 3  ;;  %v688_v56 = vpop.f32.mrf.mxu3 }
 0x1bd   : > { %v1559_v39 = vrot.slane %v567_v10, 2  ;;  %v1746_v59 = vrot.slane %v688_v56, 2 }
 0x1be   : > { %v1382_v8 = vsel %vm1329_vm3, %v1379_v52, %v1381_v23  ;;  %v1918_v6 = vsel %vm1869_vm4, %v1915_v44, %v1917_v17  ;;  %3369 = vmatmul.msk.bf16.vlgmr.msra.gmra.mxu1 %vm197_vm1, %v4107_v36  ;;  %3432 = vmatmul.msk.bf16.vlgmr.msra.gmra.mxu0 %vm197_vm1, %v4107_v36 }
 0x1bf   : > { %v1560_v0 = vsel %vm1509_vm2, %v1557_v57, %v1559_v39  ;;  %v4189_v29 = vadd.f32 %v1918_v6, %v1819_v1  ;;  %v4195_v48 = vsel %vm1509_vm2, %v1744_v9, %v1746_v59  ;;  %v1462_v7 = vadd.f32 %v1382_v8, %v3733_v50 }
 0x1c0   : > { %v1641_v63 = vadd.f32 %v1560_v0, %v1461_v24  ;;  %3414 = vmatmul.msk.bf16.gmra.mxu3 %vm197_vm1, %v4198_v38 }
 0x1c1   : > { %3390 = vmatmul.msk.bf16.vlgmr.msra.gmra.mxu2 %vm197_vm1, %v4107_v36 }
 0x1c2   : > { %v1820_v46 = vadd.f32 %v4133_v31, %v1641_v63 }
 0x1c3   : > { %v464_v47 = vpop.f32.mrf.mxu1  ;;  %v786_v60 = vpop.f32.mrf.mxu0 }
 0x1c4   : > { %v570_v33 = vpop.f32.mrf.mxu2  ;;  %v1383_v52 = vrot.slane %v464_v47, 1  ;;  %v1919_v44 = vrot.slane %v786_v60, 3  ;;  %v691_v25 = vpop.f32.mrf.mxu3 }
 0x1c5   : > { %v1561_v57 = vrot.slane %v570_v33, 2  ;;  %v1748_v13 = vrot.slane %v691_v25, 2  ;;  %v4229_v33 = vld [vmem:[%s3600_s29 + $0x20] sm:$0xff] }
 0x1c6   : > { %v1384_v58 = vsel %vm1329_vm3, %v1381_v23, %v1383_v52  ;;  %v1920_v3 = vsel %vm1869_vm4, %v1917_v17, %v1919_v44 }
 0x1c7   : > { %v1562_v36 = vsel %vm1509_vm2, %v1559_v39, %v1561_v57  ;;  %v4206_v30 = vadd.f32 %v1920_v3, %v1820_v46  ;;  %v4210_v1 = vsel %vm1509_vm2, %v1746_v59, %v1748_v13  ;;  %v1463_v39 = vadd.f32 %v1384_v58, %v3742_v54 }
 0x1c8   : > { %v1642_v31 = vadd.f32 %v1562_v36, %v1462_v7  ;;  %v5077_v7 = vld [vmem:[#allocation6_spill] sm:$0xff] }
 0x1ca   : > { %v1821_v9 = vadd.f32 %v4148_v40, %v1642_v31 }
 0x1cb   : > { %v467_v42 = vpop.f32.mrf.mxu1  ;;  %v789_v5 = vpop.f32.mrf.mxu0 }
 0x1cc   : > { %v572_v10 = vpop.f32.mrf.mxu2  ;;  %v1385_v24 = vrot.slane %v467_v42, 1  ;;  %v1921_v0 = vrot.slane %v789_v5, 3  ;;  %v693_v17 = vpop.f32.mrf.mxu3 }
 0x1cd   : > { %v1563_v50 = vrot.slane %v572_v10, 2  ;;  %v1750_v8 = vrot.slane %v693_v17, 2  ;;  %v5078_v17 = vld [vmem:[#allocation7_spill] sm:$0xff] }
 0x1ce   : > { %v1386_v63 = vsel %vm1329_vm3, %v1383_v52, %v1385_v24  ;;  %v1922_v40 = vsel %vm1869_vm4, %v1919_v44, %v1921_v0  ;;  %3370 = vmatmul.msk.bf16.gmra.mxu1 %vm197_vm1, %v4136_v4  ;;  %3433 = vmatmul.msk.bf16.gmra.mxu0 %vm197_vm1, %v4136_v4 }
 0x1cf   : > { %v1564_v23 = vsel %vm1509_vm2, %v1561_v57, %v1563_v50  ;;  %v4220_v6 = vadd.f32 %v1922_v40, %v1821_v9  ;;  %v4226_v59 = vsel %vm1509_vm2, %v1748_v13, %v1750_v8  ;;  %v1464_v52 = vadd.f32 %v1386_v63, %v5077_v7  ;;  %v4260_v7 = vld [vmem:[%s3600_s29 + $0x28] sm:$0xff] }
 0x1d0   : > { %v1643_v56 = vadd.f32 %v1564_v23, %v1463_v39  ;;  %3415 = vmatmul.msk.bf16.gmra.mxu3 %vm197_vm1, %v4229_v33 }
 0x1d1   : > { %3391 = vmatmul.msk.bf16.gmra.mxu2 %vm197_vm1, %v4136_v4 }
 0x1d2   : > { %v1822_v54 = vadd.f32 %v4164_v21, %v1643_v56 }
 0x1d3   : > { %v469_v47 = vpop.f32.mrf.mxu1  ;;  %v791_v60 = vpop.f32.mrf.mxu0 }
 0x1d4   : > { %v575_v46 = vpop.f32.mrf.mxu2  ;;  %v1387_v44 = vrot.slane %v469_v47, 1  ;;  %v1923_v36 = vrot.slane %v791_v60, 3  ;;  %v696_v25 = vpop.f32.mrf.mxu3 }
 0x1d5   : > { %v1565_v57 = vrot.slane %v575_v46, 2  ;;  %v1752_v3 = vrot.slane %v696_v25, 2 }
 0x1d6   : > { %v1388_v31 = vsel %vm1329_vm3, %v1385_v24, %v1387_v44  ;;  %v1924_v58 = vsel %vm1869_vm4, %v1921_v0, %v1923_v36 }
 0x1d7   : > { %v1566_v4 = vsel %vm1509_vm2, %v1563_v50, %v1565_v57  ;;  %v4237_v13 = vadd.f32 %v1924_v58, %v1822_v54  ;;  %v4241_v10 = vsel %vm1509_vm2, %v1750_v8, %v1752_v3  ;;  %v1465_v50 = vadd.f32 %v1388_v31, %v5078_v17 }
 0x1d8   : > { %v1644_v21 = vadd.f32 %v1566_v4, %v1464_v52  ;;  %v5079_v4 = vld [vmem:[#allocation8_spill] sm:$0xff]  ;;  %v3548_v58 = vmov 0  }
 0x1d9   : > { %3487 = vset.pattern.permute.xlu0 %v3548_v58  ;;  %3488 = vset.pattern.permute.xlu1 %v3548_v58 }
 0x1da   : > { %v1823_v9 = vadd.f32 %v4179_v16, %v1644_v21  ;;  %3489 = vset.pattern.permute.xlu2 %v3548_v58 }
 0x1db   : > { %v472_v39 = vpop.f32.mrf.mxu1  ;;  %v794_v23 = vpop.f32.mrf.mxu0 }
 0x1dc   : > { %v577_v42 = vpop.f32.mrf.mxu2  ;;  %v1389_v56 = vrot.slane %v472_v39, 1  ;;  %v1925_v63 = vrot.slane %v794_v23, 3  ;;  %v698_v0 = vpop.f32.mrf.mxu3 }
 0x1dd   : > { %v1567_v5 = vrot.slane %v577_v42, 2  ;;  %v1754_v8 = vrot.slane %v698_v0, 2 }
 0x1de   : > { %v1390_v54 = vsel %vm1329_vm3, %v1387_v44, %v1389_v56  ;;  %v1926_v16 = vsel %vm1869_vm4, %v1923_v36, %v1925_v63  ;;  %3371 = vmatmul.msk.bf16.gmra.mxu1 %vm197_vm1, %v4167_v18  ;;  %3434 = vmatmul.msk.bf16.gmra.mxu0 %vm197_vm1, %v4167_v18 }
 0x1df   : > { %v1568_v24 = vsel %vm1509_vm2, %v1565_v57, %v1567_v5  ;;  %v4251_v46 = vadd.f32 %v1926_v16, %v1823_v9  ;;  %v4257_v47 = vsel %vm1509_vm2, %v1752_v3, %v1754_v8  ;;  %v1466_v25 = vadd.f32 %v1390_v54, %v5079_v4  ;;  %v5080_v16 = vld [vmem:[#allocation9_spill] sm:$0xff] }
 0x1e0   : > { %v1645_v40 = vadd.f32 %v1568_v24, %v1465_v50  ;;  %3416 = vmatmul.msk.bf16.gmra.mxu3 %vm197_vm1, %v4260_v7 }
 0x1e1   : > { %3392 = vmatmul.msk.bf16.gmra.mxu2 %vm197_vm1, %v4167_v18  ;;  %v2821_v18 = vld [vmem:[%s5064_s3] sm:$0xff] }
 0x1e2   : > { %v1824_v57 = vadd.f32 %v4195_v48, %v1645_v40  ;;  %2859 = vperm.xlu0 %3487, %v2821_v18   ;;  %v4302_v18 = vld [vmem:[%s3600_s29 + $0x30] sm:$0xff] }
 0x1e3   : > { %v474_v44 = vpop.f32.mrf.mxu1  ;;  %v796_v36 = vpop.f32.mrf.mxu0 }
 0x1e4   : > { %v580_v60 = vpop.f32.mrf.mxu2  ;;  %v1391_v21 = vrot.slane %v474_v44, 1  ;;  %v1927_v31 = vrot.slane %v796_v36, 3  ;;  %v701_v3 = vpop.f32.mrf.mxu3 }
 0x1e5   : > { %v1569_v52 = vrot.slane %v580_v60, 2  ;;  %v1756_v23 = vrot.slane %v701_v3, 2 }
 0x1e6   : > { %v1392_v42 = vsel %vm1329_vm3, %v1389_v56, %v1391_v21  ;;  %v1928_v39 = vsel %vm1869_vm4, %v1925_v63, %v1927_v31  ;;  %v2822_v56 = vld [vmem:[%s5064_s3 + $0x8] sm:$0xff] }
 0x1e7   : > { %v1570_v48 = vsel %vm1509_vm2, %v1567_v5, %v1569_v52  ;;  %v4271_v17 = vadd.f32 %v1928_v39, %v1824_v57  ;;  %v4275_v24 = vsel %vm1509_vm2, %v1754_v8, %v1756_v23  ;;  %v1467_v60 = vadd.f32 %v1392_v42, %v5080_v16  ;;  %v5081_v42 = vld [vmem:[#allocation10_spill] sm:$0xff] }
 0x1e8   : > { %v1646_v9 = vadd.f32 %v1570_v48, %v1466_v25 }
 0x1ea   : > { %v1825_v50 = vadd.f32 %v4210_v1, %v1646_v9  ;;  %2864 = vperm.xlu0 %3487, %v2822_v56  }
 0x1eb   : > { %v477_v54 = vpop.f32.mrf.mxu1  ;;  %v799_v5 = vpop.f32.mrf.mxu0 }
 0x1ec   : > { %v582_v0 = vpop.f32.mrf.mxu2  ;;  %v1393_v44 = vrot.slane %v477_v54, 1  ;;  %v1929_v36 = vrot.slane %v799_v5, 3  ;;  %v4282_v57 = vpop.f32.mrf.mxu3 }
 0x1ed   : > { %v1571_v40 = vrot.slane %v582_v0, 2  ;;  %v1758_v25 = vrot.slane %v4282_v57, 2 }
 0x1ee   : > { %v1394_v8 = vsel %vm1329_vm3, %v1391_v21, %v1393_v44  ;;  %v1930_v4 = vsel %vm1869_vm4, %v1927_v31, %v1929_v36  ;;  %3372 = vmatmul.msk.bf16.gmra.mxu1 %vm197_vm1, %v4198_v38  ;;  %3435 = vmatmul.msk.bf16.gmra.mxu0 %vm197_vm1, %v4198_v38 }
 0x1ef   : > { %v1572_v63 = vsel %vm1509_vm2, %v1569_v52, %v1571_v40  ;;  %v4291_v58 = vadd.f32 %v1930_v4, %v1825_v50  ;;  %v4299_v21 = vsel %vm1509_vm2, %v1756_v23, %v1758_v25  ;;  %v1468_v39 = vadd.f32 %v1394_v8, %v5081_v42  ;;  %v2824_v42 = vld [vmem:[%s5064_s3 + $0x18] sm:$0xff] }
 0x1f0   : > { %v1647_v1 = vadd.f32 %v1572_v63, %v1467_v60  ;;  %3417 = vmatmul.msk.bf16.gmra.mxu3 %vm197_vm1, %v4302_v18 }
 0x1f1   : > { %3393 = vmatmul.msk.bf16.gmra.mxu2 %vm197_vm1, %v4198_v38 }
 0x1f2   : > { %v1826_v52 = vadd.f32 %v4226_v59, %v1647_v1  ;;  %v2823_v59 = vld [vmem:[%s5064_s3 + $0x10] sm:$0xff] }
 0x1f3   : > { %v479_v3 = vpop.f32.mrf.mxu1  ;;  %v801_v9 = vpop.f32.mrf.mxu0  ;;  %2869 = vperm.xlu1 %3488, %v2823_v59  }
 0x1f4   : > { %v585_v31 = vpop.f32.mrf.mxu2  ;;  %v1395_v50 = vrot.slane %v479_v3, 1  ;;  %v1931_v38 = vrot.slane %v801_v9, 3  ;;  %v706_v0 = vpop.f32.mrf.mxu3 }
 0x1f5   : > { %v1573_v48 = vrot.slane %v585_v31, 2  ;;  %v5082_v31 = vld [vmem:[#allocation11_spill] sm:$0xff] }
 0x1f6   : > { %v1396_v5 = vsel %vm1329_vm3, %v1393_v44, %v1395_v50  ;;  %v1932_v16 = vsel %vm1869_vm4, %v1929_v36, %v1931_v38  ;;  %v4333_v0 = vld [vmem:[%s3600_s29 + $0x38] sm:$0xff] }
 0x1f7   : > { %v1574_v23 = vsel %vm1509_vm2, %v1571_v40, %v1573_v48  ;;  %v4313_v60 = vadd.f32 %v1932_v16, %v1826_v52  ;;  %v1469_v3 = vadd.f32 %v1396_v5, %v5082_v31  ;;  %v5084_v5 = vld [vmem:[#allocation12_spill] sm:$0xff] }
 0x1f8   : > { %v1648_v54 = vadd.f32 %v1574_v23, %v1468_v39 }
 0x1fa   : > { %v1827_v56 = vadd.f32 %v4241_v10, %v1648_v54 }
 0x1fb   : > { %v482_v8 = vpop.f32.mrf.mxu1  ;;  %v804_v4 = vpop.f32.mrf.mxu0  ;;  %2874 = vperm.xlu1 %3488, %v2824_v42  }
 0x1fc   : > { %v587_v63 = vpop.f32.mrf.mxu2  ;;  %v1397_v9 = vrot.slane %v482_v8, 1  ;;  %v1933_v40 = vrot.slane %v804_v4, 3  ;;  %v707_v36 = vpop.f32.mrf.mxu3 }
 0x1fd   : > { %v1575_v1 = vrot.slane %v587_v63, 2  ;;  %v5086_v36 = vld [vmem:[#allocation14_spill] sm:$0xff] }
 0x1fe   : > { %v1398_v10 = vsel %vm1329_vm3, %v1395_v50, %v1397_v9  ;;  %v1934_v39 = vsel %vm1869_vm4, %v1931_v38, %v1933_v40  ;;  %3373 = vmatmul.msk.bf16.gmra.mxu1 %vm197_vm1, %v4229_v33  ;;  %3436 = vmatmul.msk.bf16.gmra.mxu0 %vm197_vm1, %v4229_v33 }
 0x1ff   : > { %v1576_v44 = vsel %vm1509_vm2, %v1573_v48, %v1575_v1  ;;  %v4327_v59 = vadd.f32 %v1934_v39, %v1827_v56  ;;  %v1470_v16 = vadd.f32 %v1398_v10, %v5084_v5 }
 0x200   : > { %v1649_v52 = vadd.f32 %v1576_v44, %v1469_v3  ;;  %3418 = vmatmul.msk.bf16.gmra.mxu3 %vm197_vm1, %v4333_v0 }
 0x201   : > { %5083 = vst [vmem:[#allocation6_spill] sm:$0xff] %v4327_v59  ;;  %3394 = vmatmul.msk.bf16.gmra.mxu2 %vm197_vm1, %v4229_v33 }
 0x202   : > { %v1828_v48 = vadd.f32 %v4257_v47, %v1649_v52 }
 0x203   : > { %v484_v38 = vpop.f32.mrf.mxu1  ;;  %v806_v54 = vpop.f32.mrf.mxu0 }
 0x204   : > { %v590_v23 = vpop.f32.mrf.mxu2  ;;  %v1399_v63 = vrot.slane %v484_v38, 1  ;;  %v1935_v8 = vrot.slane %v806_v54, 3  ;;  %v709_v4 = vpop.f32.mrf.mxu3  ;;  %v5087_v38 = vld [vmem:[#allocation13_spill] sm:$0xff] }
 0x205   : > { %v1577_v50 = vrot.slane %v590_v23, 2  ;;  %v3500_v4 = vld [vmem:[%s3600_s29 + $0x40] sm:$0xff] }
 0x206   : > { %v1400_v33 = vsel %vm1329_vm3, %v1397_v9, %v1399_v63  ;;  %v1936_v47 = vsel %vm1869_vm4, %v1933_v40, %v1935_v8  ;;  %v1472_v52 = vadd.f32 %v1399_v63, %v5086_v36  ;;  %v2825_v36 = vld [vmem:[%s5064_s3 + $0x20] sm:$0xff] }
 0x207   : > { %v1578_v56 = vsel %vm1509_vm2, %v1575_v1, %v1577_v50  ;;  %v4341_v3 = vadd.f32 %v1936_v47, %v1828_v48  ;;  %v1471_v54 = vadd.f32 %v1400_v33, %v5087_v38  ;;  %v2827_v33 = vld [vmem:[%s5064_s3 + $0x30] sm:$0xff]  ;;  %2879 = vperm.xlu2 %3489, %v2825_v36  }
 0x208   : > { %v1650_v31 = vadd.f32 %v1578_v56, %v1470_v16  ;;  %2889 = vperm.xlu0 %3487, %v2827_v33  }
 0x209   : > { %5085 = vst [vmem:[#allocation7_spill] sm:$0xff] %v4341_v3 }
 0x20a   : > { %v1829_v42 = vadd.f32 %v4275_v24, %v1650_v31 }
 0x20b   : > { %v487_v23 = vpop.f32.mrf.mxu1  ;;  %v809_v10 = vpop.f32.mrf.mxu0 }
 0x20c   : > { %v592_v44 = vpop.f32.mrf.mxu2  ;;  %v1937_v1 = vrot.slane %v809_v10, 3  ;;  %v710_v9 = vpop.f32.mrf.mxu3 }
 0x20d   : > { %v1579_v39 = vrot.slane %v592_v44, 2  ;;  %v2826_v9 = vld [vmem:[%s5064_s3 + $0x28] sm:$0xff] }
 0x20e   : > { %v1938_v40 = vsel %vm1869_vm4, %v1935_v8, %v1937_v1  ;;  %3374 = vmatmul.msk.bf16.gmra.mxu1 %vm197_vm1, %v4260_v7  ;;  %3437 = vmatmul.msk.bf16.gmra.mxu0 %vm197_vm1, %v4260_v7 }
 0x20f   : > { %v1580_v5 = vsel %vm1509_vm2, %v1577_v50, %v1579_v39  ;;  %v1652_v16 = vadd.f32 %v1579_v39, %v1472_v52  ;;  %v4354_v48 = vadd.f32 %v1938_v40, %v1829_v42  ;;  %v2828_v52 = vld [vmem:[%s5064_s3 + $0x38] sm:$0xff]  ;;  %2884 = vperm.xlu2 %3489, %v2826_v9   ;;  %v2833_v9 = vld [vmem:[%s5064_s3 + $0x60] sm:$0xff] }
 0x210   : > { %v1651_v56 = vadd.f32 %v1580_v5, %v1471_v54  ;;  %3419 = vmatmul.msk.bf16.gmra.mxu3 %vm197_vm1, %v3500_v4  ;;  %2894 = vperm.xlu1 %3488, %v2828_v52  }
 0x211   : > { %v1831_v24 = vadd.f32 %v1758_v25, %v1652_v16  ;;  %5088 = vst [vmem:[#allocation8_spill] sm:$0xff] %v4354_v48  ;;  %3395 = vmatmul.msk.bf16.gmra.mxu2 %vm197_vm1, %v4260_v7 }
 0x212   : > { %v1830_v50 = vadd.f32 %v4299_v21, %v1651_v56 }
 0x213   : > { %v488_v8 = vpop.f32.mrf.mxu1  ;;  %v811_v31 = vpop.f32.mrf.mxu0 }
 0x214   : > { %v595_v63 = vpop.f32.mrf.mxu2  ;;  %v1939_v47 = vrot.slane %v811_v31, 3  ;;  %v1048_v57 = vpop.f32.mrf.mxu3  ;;  %v4397_v31 = vld [vmem:[%s3600_s29 + $0x50] sm:$0xff] }
 0x215   : > { %v2831_v57 = vld [vmem:[%s5064_s3 + $0x50] sm:$0xff] }
 0x216   : > { %v1940_v25 = vsel %vm1869_vm4, %v1937_v1, %v1939_v47  ;;  %v3501_v1 = vld [vmem:[%s3600_s29 + $0x48] sm:$0xff] }
 0x217   : > { %v4365_v42 = vadd.f32 %v1940_v25, %v1830_v50 }
 0x218   : > { %2909 = vperm.xlu1 %3488, %v2831_v57  }
 0x219   : > { %5089 = vst [vmem:[#allocation9_spill] sm:$0xff] %v4365_v42 }
 0x21b   : > { %v490_v21 = vpop.f32.mrf.mxu1  ;;  %v814_v44 = vpop.f32.mrf.mxu0 }
 0x21c   : > { %v596_v7 = vpop.f32.mrf.mxu2  ;;  %v1941_v39 = vrot.slane %v814_v44, 3  ;;  %v1049_v23 = vpop.f32.mrf.mxu3 }
 0x21e   : > { %v1942_v10 = vsel %vm1869_vm4, %v1939_v47, %v1941_v39  ;;  %3375 = vmatmul.msk.bf16.gmra.mxu1 %vm197_vm1, %v4302_v18  ;;  %3438 = vmatmul.msk.bf16.gmra.mxu0 %vm197_vm1, %v4302_v18 }
 0x21f   : > { %v4378_v38 = vadd.f32 %v1942_v10, %v1831_v24 }
 0x220   : > { %3420 = vmatmul.msk.bf16.gmra.mxu3 %vm197_vm1, %v3501_v1 }
 0x221   : > { %5090 = vst [vmem:[#allocation10_spill] sm:$0xff] %v4378_v38  ;;  %3396 = vmatmul.msk.bf16.gmra.mxu2 %vm197_vm1, %v4302_v18  ;;  %v2830_v18 = vld [vmem:[%s5064_s3 + $0x48] sm:$0xff] }
 0x222   : > { %2904 = vperm.xlu0 %3487, %v2830_v18  }
 0x223   : > { %v491_v5 = vpop.f32.mrf.mxu1  ;;  %v816_v16 = vpop.f32.mrf.mxu0 }
 0x224   : > { %v598_v54 = vpop.f32.mrf.mxu2  ;;  %v1051_v56 = vpop.f32.mrf.mxu3 }
 0x225   : > { %v4414_v54 = vld [vmem:[%s3600_s29 + $0x58] sm:$0xff] }
 0x22a   : > { %2919 = vperm.xlu0 %3487, %v2833_v9  }
 0x22b   : > { %v493_v50 = vpop.f32.mrf.mxu1  ;;  %v818_v24 = vpop.f32.mrf.mxu0 }
 0x22c   : > { %v599_v40 = vpop.f32.mrf.mxu2  ;;  %v1052_v63 = vpop.f32.mrf.mxu3 }
 0x22d   : > { %v2834_v63 = vld [vmem:[%s5064_s3 + $0x68] sm:$0xff] }
 0x22e   : > { %3376 = vmatmul.msk.bf16.gmra.mxu1 %vm197_vm1, %v4333_v0  ;;  %3439 = vmatmul.msk.bf16.gmra.mxu0 %vm197_vm1, %v4333_v0 }
 0x22f   : > { %2924 = vperm.xlu1 %3488, %v2834_v63  }
 0x230   : > { %3421 = vmatmul.msk.bf16.gmra.mxu3 %vm197_vm1, %v4397_v31 }
 0x231   : > { %3397 = vmatmul.msk.bf16.gmra.mxu2 %vm197_vm1, %v4333_v0  ;;  %v2829_v0 = vld [vmem:[%s5064_s3 + $0x40] sm:$0xff] }
 0x232   : > { %2899 = vperm.xlu2 %3489, %v2829_v0  }
 0x233   : > { %v494_v33 = vpop.f32.mrf.mxu1  ;;  %v819_v47 = vpop.f32.mrf.mxu0 }
 0x234   : > { %v601_v8 = vpop.f32.mrf.mxu2  ;;  %v1054_v25 = vpop.f32.mrf.mxu3 }
 0x235   : > { %v2418_v36 = vrot.slane %v1054_v25, 5 }
 0x23b   : > { %v830_v21 = vpop.f32.mrf.mxu1  ;;  %v1157_v44 = vpop.f32.mrf.mxu0 }
 0x23c   : > { %v602_v7 = vpop.f32.mrf.mxu2  ;;  %v1056_v52 = vpop.f32.mrf.mxu3 }
 0x23d   : > { %v2419_v39 = vrot.slane %v1056_v52, 5  ;;  %v4434_v7 = vld [vmem:[%s3600_s29 + $0x60] sm:$0xff] }
 0x23e   : > { %3377 = vmatmul.msk.bf16.gmra.mxu1 %vm197_vm1, %v3500_v4  ;;  %3440 = vmatmul.msk.bf16.gmra.mxu0 %vm197_vm1, %v3500_v4 }
 0x23f   : > { %v4411_v23 = vsel %vm2417_vm5, %v2418_v36, %v2419_v39  ;;  %v2832_v36 = vld [vmem:[%s5064_s3 + $0x58] sm:$0xff] }
 0x240   : > { %3422 = vmatmul.msk.bf16.gmra.mxu3 %vm197_vm1, %v4414_v54  ;;  %2914 = vperm.xlu2 %3489, %v2832_v36  }
 0x241   : > { %3398 = vmatmul.msk.bf16.gmra.mxu2 %vm197_vm1, %v3500_v4 }
 0x243   : > { %v831_v5 = vpop.f32.mrf.mxu1  ;;  %v1158_v16 = vpop.f32.mrf.mxu0 }
 0x244   : > { %v939_v10 = vpop.f32.mrf.mxu2  ;;  %v1059_v56 = vpop.f32.mrf.mxu3 }
 0x245   : > { %v2421_v4 = vrot.slane %v1059_v56, 5 }
 0x247   : > { %v4422_v40 = vsel %vm2417_vm5, %v2419_v39, %v2421_v4 }
 0x24b   : > { %v833_v24 = vpop.f32.mrf.mxu1  ;;  %v1160_v18 = vpop.f32.mrf.mxu0 }
 0x24c   : > { %v940_v50 = vpop.f32.mrf.mxu2  ;;  %v1061_v8 = vpop.f32.mrf.mxu3  ;;  %v2053_v57 = vrot.slane %v833_v24, 4 }
 0x24d   : > { %v2423_v33 = vrot.slane %v1061_v8, 5  ;;  %v2836_v50 = vld [vmem:[%s5064_s3 + $0x78] sm:$0xff] }
 0x24e   : > { %3378 = vmatmul.msk.bf16.gmra.mxu1 %vm197_vm1, %v3501_v1  ;;  %3441 = vmatmul.msk.bf16.gmra.mxu0 %vm197_vm1, %v3501_v1 }
 0x24f   : > { %v4431_v47 = vsel %vm2417_vm5, %v2421_v4, %v2423_v33  ;;  %2934 = vperm.xlu0 %3487, %v2836_v50  }
 0x250   : > { %3423 = vmatmul.msk.bf16.gmra.mxu3 %vm197_vm1, %v4434_v7 }
 0x251   : > { %3399 = vmatmul.msk.bf16.gmra.mxu2 %vm197_vm1, %v3501_v1 }
 0x253   : > { %v835_v21 = vpop.f32.mrf.mxu1  ;;  %v1161_v44 = vpop.f32.mrf.mxu0 }
 0x254   : > { %v942_v25 = vpop.f32.mrf.mxu2  ;;  %v2054_v0 = vrot.slane %v835_v21, 4  ;;  %v1064_v1 = vpop.f32.mrf.mxu3 }
 0x255   : > { %v2425_v39 = vrot.slane %v1064_v1, 5  ;;  %v4461_v25 = vld [vmem:[%s3600_s29 + $0x68] sm:$0xff] }
 0x256   : > { %v2055_v52 = vsel %vm2052_vm6, %v2053_v57, %v2054_v0 }
 0x257   : > { %v2162_v10 = vadd.f32 %v2055_v52, %v3861_v34  ;;  %v4444_v5 = vsel %vm2417_vm5, %v2423_v33, %v2425_v39 }
 0x25b   : > { %v838_v9 = vpop.f32.mrf.mxu1  ;;  %v1163_v56 = vpop.f32.mrf.mxu0 }
 0x25c   : > { %v943_v16 = vpop.f32.mrf.mxu2  ;;  %v2056_v4 = vrot.slane %v838_v9, 4  ;;  %v1066_v24 = vpop.f32.mrf.mxu3  ;;  %v2600_v33 = vrot.slane %v1163_v56, 6 }
 0x25d   : > { %v2427_v63 = vrot.slane %v1066_v24, 5 }
 0x25e   : > { %v2057_v18 = vsel %vm2052_vm6, %v2054_v0, %v2056_v4  ;;  %3379 = vmatmul.msk.bf16.gmra.mxu1 %vm197_vm1, %v4397_v31  ;;  %3442 = vmatmul.msk.bf16.gmra.mxu0 %vm197_vm1, %v4397_v31 }
 0x25f   : > { %v2163_v34 = vadd.f32 %v2057_v18, %v3874_v49  ;;  %v4458_v8 = vsel %vm2417_vm5, %v2425_v39, %v2427_v63  ;;  %v2837_v49 = vld [vmem:[%s5064_s3 + $0x80] sm:$0xff] }
 0x260   : > { %3424 = vmatmul.msk.bf16.gmra.mxu3 %vm197_vm1, %v4461_v25  ;;  %2939 = vperm.xlu1 %3488, %v2837_v49   ;;  %v2835_v49 = vld [vmem:[%s5064_s3 + $0x70] sm:$0xff] }
 0x261   : > { %3400 = vmatmul.msk.bf16.gmra.mxu2 %vm197_vm1, %v4397_v31  ;;  %2929 = vperm.xlu2 %3489, %v2835_v49  }
 0x263   : > { %v840_v21 = vpop.f32.mrf.mxu1  ;;  %v1165_v44 = vpop.f32.mrf.mxu0 }
 0x264   : > { %v945_v57 = vpop.f32.mrf.mxu2  ;;  %v2058_v0 = vrot.slane %v840_v21, 4  ;;  %v2601_v36 = vrot.slane %v1165_v44, 6  ;;  %v1069_v31 = vpop.f32.mrf.mxu3 }
 0x265   : > { %v2429_v39 = vrot.slane %v1069_v31, 5  ;;  %v2235_v50 = vrot.slane %v945_v57, 4 }
 0x266   : > { %v2059_v1 = vsel %vm2052_vm6, %v2056_v4, %v2058_v0  ;;  %v2602_v52 = vsel %vm261_vm0, %v2600_v33, %v2601_v36 }
 0x267   : > { %v2164_v16 = vadd.f32 %v2059_v1, %v3888_v27  ;;  %v4472_v9 = vsel %vm2417_vm5, %v2427_v63, %v2429_v39 }
 0x26b   : > { %v843_v18 = vpop.f32.mrf.mxu1  ;;  %v1168_v21 = vpop.f32.mrf.mxu0 }
 0x26c   : > { %v947_v56 = vpop.f32.mrf.mxu2  ;;  %v2060_v44 = vrot.slane %v843_v18, 4  ;;  %v2603_v38 = vrot.slane %v1168_v21, 6  ;;  %v1071_v33 = vpop.f32.mrf.mxu3  ;;  %v4494_v18 = vld [vmem:[%s3600_s29 + $0x70] sm:$0xff] }
 0x26d   : > { %v2236_v24 = vrot.slane %v947_v56, 4  ;;  %v2431_v1 = vrot.slane %v1071_v33, 5 }
 0x26e   : > { %v2061_v63 = vsel %vm2052_vm6, %v2058_v0, %v2060_v44  ;;  %v2604_v31 = vsel %vm261_vm0, %v2601_v36, %v2603_v38  ;;  %3380 = vmatmul.msk.bf16.gmra.mxu1 %vm197_vm1, %v4414_v54  ;;  %3443 = vmatmul.msk.bf16.gmra.mxu0 %vm197_vm1, %v4414_v54  ;;  %v2860_v36 = vpop.permute.xlu0 %2859 }
 0x26f   : > { %v2237_v4 = vsel %vm2052_vm6, %v2235_v50, %v2236_v24  ;;  %v4485_v57 = vadd.f32 %v2061_v63, %v3902_v62 }
 0x270   : > { %v2344_v27 = vadd.f32 %v2237_v4, %v2162_v10  ;;  %v4491_v10 = vsel %vm2417_vm5, %v2429_v39, %v2431_v1  ;;  %3425 = vmatmul.msk.bf16.gmra.mxu3 %vm197_vm1, %v4494_v18 }
 0x271   : > { %3401 = vmatmul.msk.bf16.gmra.mxu2 %vm197_vm1, %v4414_v54  ;;  %v2839_v54 = vld [vmem:[%s5064_s3 + $0x90] sm:$0xff] }
 0x272   : > { %v2527_v56 = vadd.f32 %v4411_v23, %v2344_v27  ;;  %v4501_v23 = vld [vmem:[%s5063_s2] ss:$0 sm:$0xff]  ;;  %2949 = vperm.xlu0 %3487, %v2839_v54  }
 0x273   : > { %v845_v62 = vpop.f32.mrf.mxu1  ;;  %v1170_v49 = vpop.f32.mrf.mxu0 }
 0x274   : > { %v950_v0 = vpop.f32.mrf.mxu2  ;;  %v2709_v50 = vadd.f32 %v2602_v52, %v2527_v56  ;;  %v2062_v4 = vrot.slane %v845_v62, 4  ;;  %v2605_v63 = vrot.slane %v1170_v49, 6  ;;  %v1074_v39 = vpop.f32.mrf.mxu3 }
 0x275   : > { %v2238_v21 = vrot.slane %v950_v0, 4  ;;  %v2433_v62 = vrot.slane %v1074_v39, 5 }
 0x276   : > { %v2063_v27 = vsel %vm2052_vm6, %v2060_v44, %v2062_v4  ;;  %v2606_v56 = vsel %vm261_vm0, %v2603_v38, %v2605_v63  ;;  %v2749_v49 = vadd.f32 %v4501_v23, %v2709_v50  ;;  %v2840_v38 = vld [vmem:[%s5064_s3 + $0x98] sm:$0xff]  ;;  %v2865_v50 = vpop.permute.xlu0 %2864 }
 0x277   : > { %v2239_v52 = vsel %vm2052_vm6, %v2236_v24, %v2238_v21  ;;  %v4510_v0 = vadd.f32 %v2063_v27, %v3916_v11  ;;  %v4515_v48 = vsel %vm2417_vm5, %v2431_v1, %v2433_v62  ;;  %2954 = vperm.xlu1 %3488, %v2840_v38   ;;  %v2870_v38 = vpop.permute.xlu1 %2869 }
 0x278   : > { %v2345_v33 = vadd.f32 %v2239_v52, %v2163_v34  ;;  %v2785_v44 = vmax.f32 %v2749_v49, 0.0 }
 0x27a   : > { %v2528_v42 = vadd.f32 %v4422_v40, %v2345_v33 }
 0x27b   : > { %v848_v54 = vpop.f32.mrf.mxu1  ;;  %v1173_v34 = vpop.f32.mrf.mxu0 }
 0x27c   : > { %v952_v3 = vpop.f32.mrf.mxu2  ;;  %v2710_v24 = vadd.f32 %v2604_v31, %v2528_v42  ;;  %v2064_v11 = vrot.slane %v848_v54, 4  ;;  %v2607_v52 = vrot.slane %v1173_v34, 6  ;;  %v1076_v1 = vpop.f32.mrf.mxu3 }
 0x27d   : > { %v2240_v59 = vrot.slane %v952_v3, 4 }
 0x27e   : > { %v2750_v39 = vadd.f32 %v4501_v23, %v2710_v24  ;;  %v2065_v42 = vsel %vm2052_vm6, %v2062_v4, %v2064_v11  ;;  %v2608_v3 = vsel %vm261_vm0, %v2605_v63, %v2607_v52  ;;  %3381 = vmatmul.msk.bf16.gmra.mxu1 %vm197_vm1, %v4434_v7  ;;  %3444 = vmatmul.msk.bf16.gmra.mxu0 %vm197_vm1, %v4434_v7  ;;  %v2842_v24 = vld [vmem:[%s5064_s3 + $0xa8] sm:$0xff] }
 0x27f   : > { %v2241_v40 = vsel %vm2052_vm6, %v2238_v21, %v2240_v59  ;;  %v4529_v27 = vadd.f32 %v2065_v42, %v3930_v61  ;;  %v2435_v21 = vrot.slane %v1076_v1, 5  ;;  %2964 = vperm.xlu0 %3487, %v2842_v24  }
 0x280   : > { %v2346_v33 = vadd.f32 %v2241_v40, %v2164_v16  ;;  %v2786_v31 = vmax.f32 %v2750_v39, 0.0  ;;  %v3037_v16 = vmul.f32 %v2860_v36, %v2785_v44  ;;  %v4541_v39 = vld [vmem:[%s3600_s29 + $0x78] sm:$0xff] }
 0x281   : > { %3402 = vmatmul.msk.bf16.gmra.mxu2 %vm197_vm1, %v4434_v7  ;;  %v4535_v63 = vsel %vm2417_vm5, %v2433_v62, %v2435_v21  ;;  %3426 = vmatmul.msk.bf16.gmra.mxu3 %vm197_vm1, %v4541_v39  ;;  %v2843_v62 = vld [vmem:[%s5064_s3 + $0xb0] sm:$0xff] }
 0x282   : > { %v3038_v49 = vmul.f32 %v2865_v50, %v2786_v31  ;;  %v2529_v4 = vadd.f32 %v4431_v47, %v2346_v33  ;;  %2969 = vperm.xlu1 %3488, %v2843_v62  }
 0x283   : > { %v850_v36 = vpop.f32.mrf.mxu1  ;;  %v1175_v47 = vpop.f32.mrf.mxu0 }
 0x284   : > { %v3073_v54 = vadd.f32 %v3038_v49, %v3037_v16  ;;  %v955_v34 = vpop.f32.mrf.mxu2  ;;  %v2711_v61 = vadd.f32 %v2606_v56, %v2529_v4  ;;  %v2066_v44 = vrot.slane %v850_v36, 4  ;;  %v2609_v40 = vrot.slane %v1175_v47, 6  ;;  %v2838_v56 = vld [vmem:[%s5064_s3 + $0x88] sm:$0xff]  ;;  %v1079_v33 = vpop.f32.mrf.mxu3 }
 0x285   : > { %v2242_v7 = vrot.slane %v955_v34, 4  ;;  %2944 = vperm.xlu2 %3489, %v2838_v56   ;;  %v2437_v24 = vrot.slane %v1079_v33, 5 }
 0x286   : > { %v2751_v50 = vadd.f32 %v4501_v23, %v2711_v61  ;;  %v2067_v31 = vsel %vm2052_vm6, %v2064_v11, %v2066_v44  ;;  %v2610_v49 = vsel %vm261_vm0, %v2607_v52, %v2609_v40 }
 0x287   : > { %v2243_v1 = vsel %vm2052_vm6, %v2240_v59, %v2242_v7  ;;  %v4557_v4 = vadd.f32 %v2067_v31, %v3944_v19  ;;  %v4561_v36 = vsel %vm2417_vm5, %v2435_v21, %v2437_v24  ;;  %v2845_v59 = vld [vmem:[%s5064_s3 + $0xc0] sm:$0xff]  ;;  %v2846_v19 = vld [vmem:[%s5064_s3 + $0xc8] sm:$0xff] }
 0x288   : > { %v2347_v42 = vadd.f32 %v2243_v1, %v4485_v57  ;;  %v2787_v16 = vmax.f32 %v2751_v50, 0.0  ;;  %2979 = vperm.xlu0 %3487, %v2845_v59   ;;  %v2875_v1 = vpop.permute.xlu1 %2874 }
 0x28a   : > { %v3039_v34 = vmul.f32 %v2870_v38, %v2787_v16  ;;  %v2530_v61 = vadd.f32 %v4444_v5, %v2347_v42  ;;  %2984 = vperm.xlu1 %3488, %v2846_v19  }
 0x28b   : > { %v853_v52 = vpop.f32.mrf.mxu1  ;;  %v1178_v50 = vpop.f32.mrf.mxu0 }
 0x28c   : > { %v3074_v57 = vadd.f32 %v3073_v54, %v3039_v34  ;;  %v957_v47 = vpop.f32.mrf.mxu2  ;;  %v2712_v11 = vadd.f32 %v2608_v3, %v2530_v61  ;;  %v2068_v38 = vrot.slane %v853_v52, 4  ;;  %v2611_v5 = vrot.slane %v1178_v50, 6  ;;  %v1081_v33 = vpop.f32.mrf.mxu3 }
 0x28d   : > { %v2244_v62 = vrot.slane %v957_v47, 4  ;;  %v2880_v47 = vpop.permute.xlu2 %2879 }
 0x28e   : > { %v2752_v21 = vadd.f32 %v4501_v23, %v2712_v11  ;;  %v2069_v3 = vsel %vm2052_vm6, %v2066_v44, %v2068_v38  ;;  %v2612_v42 = vsel %vm261_vm0, %v2609_v40, %v2611_v5  ;;  %3382 = vmatmul.msk.bf16.gmra.mxu1 %vm197_vm1, %v4461_v25  ;;  %3445 = vmatmul.msk.bf16.gmra.mxu0 %vm197_vm1, %v4461_v25  ;;  %v2848_v40 = vld [vmem:[%s5064_s3 + $0xd8] sm:$0xff] }
 0x28f   : > { %v2245_v56 = vsel %vm2052_vm6, %v2242_v7, %v2244_v62  ;;  %v4579_v16 = vadd.f32 %v2069_v3, %v3958_v37  ;;  %v2439_v7 = vrot.slane %v1081_v33, 5  ;;  %v4591_v37 = vld [vmem:[%s3600_s29 + $0x80] sm:$0xff] }
 0x290   : > { %v2348_v54 = vadd.f32 %v2245_v56, %v4510_v0  ;;  %v2788_v31 = vmax.f32 %v2752_v21, 0.0  ;;  %2994 = vperm.xlu0 %3487, %v2848_v40  }
 0x291   : > { %3403 = vmatmul.msk.bf16.gmra.mxu2 %vm197_vm1, %v4461_v25  ;;  %v4585_v34 = vsel %vm2417_vm5, %v2437_v24, %v2439_v7  ;;  %3427 = vmatmul.msk.bf16.gmra.mxu3 %vm197_vm1, %v4591_v37  ;;  %v2849_v24 = vld [vmem:[%s5064_s3 + $0xe0] sm:$0xff] }
 0x292   : > { %v3040_v0 = vmul.f32 %v2875_v1, %v2788_v31  ;;  %v2531_v44 = vadd.f32 %v4458_v8, %v2348_v54  ;;  %2999 = vperm.xlu1 %3488, %v2849_v24   ;;  %v2844_v24 = vld [vmem:[%s5064_s3 + $0xb8] sm:$0xff] }
 0x293   : > { %v855_v52 = vpop.f32.mrf.mxu1  ;;  %v1180_v8 = vpop.f32.mrf.mxu0 }
 0x294   : > { %v3075_v61 = vadd.f32 %v3074_v57, %v3040_v0  ;;  %v960_v59 = vpop.f32.mrf.mxu2  ;;  %v2713_v11 = vadd.f32 %v2610_v49, %v2531_v44  ;;  %v2070_v50 = vrot.slane %v855_v52, 4  ;;  %v2613_v19 = vrot.slane %v1180_v8, 6  ;;  %v2841_v49 = vld [vmem:[%s5064_s3 + $0xa0] sm:$0xff]  ;;  %v1084_v56 = vpop.f32.mrf.mxu3 }
 0x295   : > { %v2246_v25 = vrot.slane %v960_v59, 4  ;;  %2959 = vperm.xlu2 %3489, %v2841_v49   ;;  %v2441_v0 = vrot.slane %v1084_v56, 5 }
 0x296   : > { %v2753_v57 = vadd.f32 %v4501_v23, %v2713_v11  ;;  %v2071_v33 = vsel %vm2052_vm6, %v2068_v38, %v2070_v50  ;;  %v2614_v3 = vsel %vm261_vm0, %v2611_v5, %v2613_v19 }
 0x297   : > { %v2247_v21 = vsel %vm2052_vm6, %v2244_v62, %v2246_v25  ;;  %v4607_v31 = vadd.f32 %v2071_v33, %v3972_v12  ;;  %v4611_v59 = vsel %vm2417_vm5, %v2439_v7, %v2441_v0  ;;  %v2851_v62 = vld [vmem:[%s5064_s3 + $0xf0] sm:$0xff]  ;;  %v2852_v12 = vld [vmem:[%s5064_s3 + $0xf8] sm:$0xff] }
 0x298   : > { %v2349_v1 = vadd.f32 %v2247_v21, %v4529_v27  ;;  %v2789_v54 = vmax.f32 %v2753_v57, 0.0  ;;  %3009 = vperm.xlu0 %3487, %v2851_v62  }
 0x29a   : > { %v3041_v44 = vmul.f32 %v2880_v47, %v2789_v54  ;;  %v2532_v40 = vadd.f32 %v4472_v9, %v2349_v1  ;;  %3014 = vperm.xlu1 %3488, %v2852_v12   ;;  %v2890_v12 = vpop.permute.xlu0 %2889 }
 0x29b   : > { %v858_v5 = vpop.f32.mrf.mxu1  ;;  %v1183_v8 = vpop.f32.mrf.mxu0 }
 0x29c   : > { %v3076_v27 = vadd.f32 %v3075_v61, %v3041_v44  ;;  %v962_v11 = vpop.f32.mrf.mxu2  ;;  %v2714_v38 = vadd.f32 %v2612_v42, %v2532_v40  ;;  %v2072_v47 = vrot.slane %v858_v5, 4  ;;  %v2615_v9 = vrot.slane %v1183_v8, 6  ;;  %v2885_v42 = vpop.permute.xlu2 %2884 }
 0x29d   : > { %v2248_v52 = vrot.slane %v962_v11, 4  ;;  %v1086_v57 = vpop.f32.mrf.mxu3  ;;  %2974 = vperm.xlu2 %3489, %v2844_v24   ;;  %v4644_v11 = vld [vmem:[%s3600_s29 + $0x88] sm:$0xff] }
 0x29e   : > { %v2754_v7 = vadd.f32 %v4501_v23, %v2714_v38  ;;  %v2073_v21 = vsel %vm2052_vm6, %v2070_v50, %v2072_v47  ;;  %v2616_v56 = vsel %vm261_vm0, %v2613_v19, %v2615_v9  ;;  %3383 = vmatmul.msk.bf16.gmra.mxu1 %vm197_vm1, %v4494_v18  ;;  %3446 = vmatmul.msk.bf16.gmra.mxu0 %vm197_vm1, %v4494_v18  ;;  %v2854_v19 = vld [vmem:[%s5064_s3 + $0x108] sm:$0xff] }
 0x29f   : > { %v2249_v61 = vsel %vm2052_vm6, %v2246_v25, %v2248_v52  ;;  %v4632_v33 = vadd.f32 %v2073_v21, %v3986_v20  ;;  %v2443_v25 = vrot.slane %v1086_v57, 5 }
 0x2a0   : > { %v2350_v49 = vadd.f32 %v2249_v61, %v4557_v4  ;;  %v2790_v1 = vmax.f32 %v2754_v7, 0.0  ;;  %3024 = vperm.xlu0 %3487, %v2854_v19  }
 0x2a1   : > { %3404 = vmatmul.msk.bf16.gmra.mxu2 %vm197_vm1, %v4494_v18  ;;  %v4638_v50 = vsel %vm2417_vm5, %v2441_v0, %v2443_v25  ;;  %3428 = vmatmul.msk.bf16.gmra.mxu3 %vm197_vm1, %v4644_v11 }
 0x2a2   : > { %v3042_v4 = vmul.f32 %v2885_v42, %v2790_v1  ;;  %v2533_v54 = vadd.f32 %v4491_v10, %v2350_v49  ;;  %v2855_v10 = vld [vmem:[%s5064_s3 + $0x110] sm:$0xff] }
 0x2a3   : > { %v860_v18 = vpop.f32.mrf.mxu1  ;;  %v1185_v38 = vpop.f32.mrf.mxu0  ;;  %3029 = vperm.xlu1 %3488, %v2855_v10  }
 0x2a4   : > { %v3077_v44 = vadd.f32 %v3076_v27, %v3042_v4  ;;  %v965_v40 = vpop.f32.mrf.mxu2  ;;  %v2715_v62 = vadd.f32 %v2614_v3, %v2533_v54  ;;  %v2074_v0 = vrot.slane %v860_v18, 4  ;;  %v2617_v5 = vrot.slane %v1185_v38, 6  ;;  %v2847_v3 = vld [vmem:[%s5064_s3 + $0xd0] sm:$0xff] }
 0x2a5   : > { %v2250_v20 = vrot.slane %v965_v40, 4  ;;  %v1089_v7 = vpop.f32.mrf.mxu3  ;;  %2989 = vperm.xlu2 %3489, %v2847_v3  }
 0x2a6   : > { %v2755_v8 = vadd.f32 %v4501_v23, %v2715_v62  ;;  %v2075_v61 = vsel %vm2052_vm6, %v2072_v47, %v2074_v0  ;;  %v2618_v57 = vsel %vm261_vm0, %v2615_v9, %v2617_v5  ;;  %v2445_v21 = vrot.slane %v1089_v7, 5 }
 0x2a7   : > { %v2251_v27 = vsel %vm2052_vm6, %v2248_v52, %v2250_v20  ;;  %v4660_v49 = vadd.f32 %v2075_v61, %v4000_v22  ;;  %v2850_v22 = vld [vmem:[%s5064_s3 + $0xe8] sm:$0xff]  ;;  %v4688_v61 = vld [vmem:[%s3600_s29 + $0x90] sm:$0xff] }
 0x2a8   : > { %v2351_v24 = vadd.f32 %v2251_v27, %v4579_v16  ;;  %v2791_v42 = vmax.f32 %v2755_v8, 0.0  ;;  %v4664_v54 = vsel %vm2417_vm5, %v2443_v25, %v2445_v21 }
 0x2aa   : > { %v3043_v1 = vmul.f32 %v2890_v12, %v2791_v42  ;;  %v2534_v4 = vadd.f32 %v4515_v48, %v2351_v24  ;;  %v2895_v48 = vpop.permute.xlu1 %2894 }
 0x2ab   : > { %v863_v16 = vpop.f32.mrf.mxu1  ;;  %v1188_v18 = vpop.f32.mrf.mxu0 }
 0x2ac   : > { %v3078_v52 = vadd.f32 %v3077_v44, %v3043_v1  ;;  %v967_v19 = vpop.f32.mrf.mxu2  ;;  %v2716_v40 = vadd.f32 %v2616_v56, %v2534_v4  ;;  %v2076_v47 = vrot.slane %v863_v16, 4  ;;  %v2619_v38 = vrot.slane %v1188_v18, 6 }
 0x2ad   : > { %v2252_v62 = vrot.slane %v967_v19, 4  ;;  %v1091_v8 = vpop.f32.mrf.mxu3  ;;  %3004 = vperm.xlu2 %3489, %v2850_v22  }
 0x2ae   : > { %v2756_v9 = vadd.f32 %v4501_v23, %v2716_v40  ;;  %v2077_v56 = vsel %vm2052_vm6, %v2074_v0, %v2076_v47  ;;  %v2620_v44 = vsel %vm261_vm0, %v2617_v5, %v2619_v38  ;;  %3384 = vmatmul.msk.bf16.gmra.mxu1 %vm197_vm1, %v4541_v39  ;;  %3447 = vmatmul.msk.bf16.gmra.mxu0 %vm197_vm1, %v4541_v39 }
 0x2af   : > { %v2253_v10 = vsel %vm2052_vm6, %v2250_v20, %v2252_v62  ;;  %v4679_v27 = vadd.f32 %v2077_v56, %v4014_v43  ;;  %v2447_v20 = vrot.slane %v1091_v8, 5 }
 0x2b0   : > { %v2352_v25 = vadd.f32 %v2253_v10, %v4607_v31  ;;  %v2792_v3 = vmax.f32 %v2756_v9, 0.0 }
 0x2b1   : > { %3405 = vmatmul.msk.bf16.gmra.mxu2 %vm197_vm1, %v4541_v39  ;;  %v4685_v0 = vsel %vm2417_vm5, %v2445_v21, %v2447_v20  ;;  %3429 = vmatmul.msk.bf16.gmra.mxu3 %vm197_vm1, %v4688_v61 }
 0x2b2   : > { %v3044_v12 = vmul.f32 %v2895_v48, %v2792_v3  ;;  %v2535_v31 = vadd.f32 %v4535_v63, %v2352_v25  ;;  %v2853_v63 = vld [vmem:[%s5064_s3 + $0x100] sm:$0xff] }
 0x2b3   : > { %v865_v42 = vpop.f32.mrf.mxu1  ;;  %v1190_v1 = vpop.f32.mrf.mxu0 }
 0x2b4   : > { %v3079_v5 = vadd.f32 %v3078_v52, %v3044_v12  ;;  %v970_v7 = vpop.f32.mrf.mxu2  ;;  %v2717_v24 = vadd.f32 %v2618_v57, %v2535_v31  ;;  %v2078_v4 = vrot.slane %v865_v42, 4  ;;  %v2621_v39 = vrot.slane %v1190_v1, 6  ;;  %v2900_v52 = vpop.permute.xlu2 %2899 }
 0x2b5   : > { %v2254_v43 = vrot.slane %v970_v7, 4  ;;  %v1094_v57 = vpop.f32.mrf.mxu3  ;;  %3019 = vperm.xlu2 %3489, %v2853_v63  }
 0x2b6   : > { %v2757_v19 = vadd.f32 %v4501_v23, %v2717_v24  ;;  %v2079_v16 = vsel %vm2052_vm6, %v2076_v47, %v2078_v4  ;;  %v2622_v9 = vsel %vm261_vm0, %v2619_v38, %v2621_v39  ;;  %v2449_v10 = vrot.slane %v1094_v57, 5  ;;  %v4729_v57 = vld [vmem:[%s3600_s29 + $0x98] sm:$0xff] }
 0x2b7   : > { %v2255_v21 = vsel %vm2052_vm6, %v2252_v62, %v2254_v43  ;;  %v4701_v22 = vadd.f32 %v2079_v16, %v4028_v51  ;;  %v2856_v51 = vld [vmem:[%s5064_s3 + $0x118] sm:$0x3f] }
 0x2b8   : > { %v2353_v40 = vadd.f32 %v2255_v21, %v4632_v33  ;;  %v2793_v18 = vmax.f32 %v2757_v19, 0.0  ;;  %v4705_v25 = vsel %vm2417_vm5, %v2447_v20, %v2449_v10 }
 0x2ba   : > { %v3045_v48 = vmul.f32 %v2900_v52, %v2793_v18  ;;  %v2536_v8 = vadd.f32 %v4561_v36, %v2353_v40  ;;  %v2905_v36 = vpop.permute.xlu0 %2904 }
 0x2bb   : > { %v868_v33 = vpop.f32.mrf.mxu1  ;;  %v1193_v31 = vpop.f32.mrf.mxu0 }
 0x2bc   : > { %v3080_v62 = vadd.f32 %v3079_v5, %v3045_v48  ;;  %v972_v56 = vpop.f32.mrf.mxu2  ;;  %v2718_v3 = vadd.f32 %v2620_v44, %v2536_v8  ;;  %v2080_v47 = vrot.slane %v868_v33, 4  ;;  %v2623_v7 = vrot.slane %v1193_v31, 6  ;;  %v2910_v8 = vpop.permute.xlu1 %2909 }
 0x2bd   : > { %v2256_v12 = vrot.slane %v972_v56, 4  ;;  %v1096_v42 = vpop.f32.mrf.mxu3  ;;  %3034 = vperm.xlu2 %3489, %v2856_v51  }
 0x2be   : > { %v2758_v38 = vadd.f32 %v4501_v23, %v2718_v3  ;;  %v2081_v44 = vsel %vm2052_vm6, %v2078_v4, %v2080_v47  ;;  %v2624_v5 = vsel %vm261_vm0, %v2621_v39, %v2623_v7  ;;  %3385 = vmatmul.msk.bf16.gmra.mxu1 %vm197_vm1, %v4591_v37  ;;  %3448 = vmatmul.msk.bf16.gmra.mxu0 %vm197_vm1, %v4591_v37 }
 0x2bf   : > { %v2257_v24 = vsel %vm2052_vm6, %v2254_v43, %v2256_v12  ;;  %v4720_v19 = vadd.f32 %v2081_v44, %v4042_v55  ;;  %v2451_v43 = vrot.slane %v1096_v42, 5 }
 0x2c0   : > { %v2354_v20 = vadd.f32 %v2257_v24, %v4660_v49  ;;  %v2794_v1 = vmax.f32 %v2758_v38, 0.0 }
 0x2c1   : > { %3406 = vmatmul.msk.bf16.gmra.mxu2 %vm197_vm1, %v4591_v37  ;;  %v4726_v4 = vsel %vm2417_vm5, %v2449_v10, %v2451_v43  ;;  %3430 = vmatmul.msk.bf16.gmra.mxu3 %vm197_vm1, %v4729_v57 }
 0x2c2   : > { %v3046_v63 = vmul.f32 %v2905_v36, %v2794_v1  ;;  %v2537_v49 = vadd.f32 %v4585_v34, %v2354_v20 }
 0x2c3   : > { %v870_v40 = vpop.f32.mrf.mxu1  ;;  %v1195_v16 = vpop.f32.mrf.mxu0 }
 0x2c4   : > { %v3081_v39 = vadd.f32 %v3080_v62, %v3046_v63  ;;  %v975_v21 = vpop.f32.mrf.mxu2  ;;  %v2719_v52 = vadd.f32 %v2622_v9, %v2537_v49  ;;  %v2082_v18 = vrot.slane %v870_v40, 4  ;;  %v2625_v37 = vrot.slane %v1195_v16, 6  ;;  %v2915_v63 = vpop.permute.xlu2 %2914 }
 0x2c5   : > { %v2258_v55 = vrot.slane %v975_v21, 4  ;;  %v1099_v10 = vpop.f32.mrf.mxu3 }
 0x2c6   : > { %v2759_v48 = vadd.f32 %v4501_v23, %v2719_v52  ;;  %v2083_v9 = vsel %vm2052_vm6, %v2080_v47, %v2082_v18  ;;  %v2626_v3 = vsel %vm261_vm0, %v2623_v7, %v2625_v37  ;;  %v2453_v31 = vrot.slane %v1099_v10, 5 }
 0x2c7   : > { %v2259_v34 = vsel %vm2052_vm6, %v2256_v12, %v2258_v55  ;;  %v4739_v33 = vadd.f32 %v2083_v9, %v4056_v2  ;;  %v2920_v9 = vpop.permute.xlu0 %2919 }
 0x2c8   : > { %v2355_v62 = vadd.f32 %v2259_v34, %v4679_v27  ;;  %v2795_v56 = vmax.f32 %v2759_v48, 0.0  ;;  %v4743_v24 = vsel %vm2417_vm5, %v2451_v43, %v2453_v31 }
 0x2ca   : > { %v3047_v38 = vmul.f32 %v2910_v8, %v2795_v56  ;;  %v2538_v51 = vadd.f32 %v4611_v59, %v2355_v62 }
 0x2cb   : > { %v873_v27 = vpop.f32.mrf.mxu1  ;;  %v1198_v44 = vpop.f32.mrf.mxu0 }
 0x2cc   : > { %v3082_v12 = vadd.f32 %v3081_v39, %v3047_v38  ;;  %v977_v36 = vpop.f32.mrf.mxu2  ;;  %v2720_v42 = vadd.f32 %v2624_v5, %v2538_v51  ;;  %v2084_v47 = vrot.slane %v873_v27, 4  ;;  %v2627_v1 = vrot.slane %v1198_v44, 6 }
 0x2cd   : > { %v2260_v20 = vrot.slane %v977_v36, 4  ;;  %v1101_v49 = vpop.f32.mrf.mxu3 }
 0x2ce   : > { %v2760_v7 = vadd.f32 %v4501_v23, %v2720_v42  ;;  %v2085_v59 = vsel %vm2052_vm6, %v2082_v18, %v2084_v47  ;;  %v2628_v43 = vsel %vm261_vm0, %v2625_v37, %v2627_v1  ;;  %3386 = vmatmul.msk.bf16.gmra.mxu1 %vm197_vm1, %v4644_v11  ;;  %3449 = vmatmul.msk.bf16.gmra.mxu0 %vm197_vm1, %v4644_v11  ;;  %v2455_v52 = vrot.slane %v1101_v49, 5 }
 0x2cf   : > { %v2261_v2 = vsel %vm2052_vm6, %v2258_v55, %v2260_v20  ;;  %v4755_v5 = vadd.f32 %v2085_v59, %v4070_v35 }
 0x2d0   : > { %v2356_v21 = vadd.f32 %v2261_v2, %v4701_v22  ;;  %v2796_v39 = vmax.f32 %v2760_v7, 0.0  ;;  %v4761_v40 = vsel %vm2417_vm5, %v2453_v31, %v2455_v52 }
 0x2d1   : > { %3407 = vmatmul.msk.bf16.gmra.mxu2 %vm197_vm1, %v4644_v11  ;;  %3431 = vmatmul.msk.bf16.gmra.mxu3 %vm197_vm1, %v3660_v26 }
 0x2d2   : > { %v3048_v55 = vmul.f32 %v2915_v63, %v2796_v39  ;;  %v2539_v22 = vadd.f32 %v4638_v50, %v2356_v21 }
 0x2d3   : > { %v875_v34 = vpop.f32.mrf.mxu1  ;;  %v1200_v35 = vpop.f32.mrf.mxu0 }
 0x2d4   : > { %v3083_v16 = vadd.f32 %v3082_v12, %v3048_v55  ;;  %v980_v18 = vpop.f32.mrf.mxu2  ;;  %v2721_v37 = vadd.f32 %v2626_v3, %v2539_v22  ;;  %v2086_v8 = vrot.slane %v875_v34, 4  ;;  %v2629_v10 = vrot.slane %v1200_v35, 6 }
 0x2d5   : > { %v2262_v48 = vrot.slane %v980_v18, 4  ;;  %v1104_v50 = vpop.f32.mrf.mxu3 }
 0x2d6   : > { %v2761_v11 = vadd.f32 %v4501_v23, %v2721_v37  ;;  %v2087_v31 = vsel %vm2052_vm6, %v2084_v47, %v2086_v8  ;;  %v2630_v3 = vsel %vm261_vm0, %v2627_v1, %v2629_v10  ;;  %v2457_v12 = vrot.slane %v1104_v50, 5 }
 0x2d7   : > { %v2263_v62 = vsel %vm2052_vm6, %v2260_v20, %v2262_v48  ;;  %v2178_v51 = vadd.f32 %v2087_v31, %v4084_v32  ;;  %v2925_v32 = vpop.permute.xlu1 %2924 }
 0x2d8   : > { %v2357_v56 = vadd.f32 %v2263_v62, %v4720_v19  ;;  %v2797_v38 = vmax.f32 %v2761_v11, 0.0  ;;  %v4773_v27 = vsel %vm2417_vm5, %v2455_v52, %v2457_v12 }
 0x2da   : > { %v3049_v36 = vmul.f32 %v2920_v9, %v2797_v38  ;;  %v2540_v42 = vadd.f32 %v4664_v54, %v2357_v56 }
 0x2db   : > { %v878_v63 = vpop.f32.mrf.mxu1  ;;  %v1203_v19 = vpop.f32.mrf.mxu0 }
 0x2dc   : > { %v3084_v44 = vadd.f32 %v3083_v16, %v3049_v36  ;;  %v982_v20 = vpop.f32.mrf.mxu2  ;;  %v2722_v7 = vadd.f32 %v2628_v43, %v2540_v42  ;;  %v2088_v49 = vrot.slane %v878_v63, 4  ;;  %v2631_v47 = vrot.slane %v1203_v19, 6 }
 0x2dd   : > { %v2264_v2 = vrot.slane %v982_v20, 4  ;;  %v1106_v59 = vpop.f32.mrf.mxu3 }
 0x2de   : > { %v2762_v1 = vadd.f32 %v4501_v23, %v2722_v7  ;;  %v2089_v54 = vsel %vm2052_vm6, %v2086_v8, %v2088_v49  ;;  %v2632_v52 = vsel %vm261_vm0, %v2629_v10, %v2631_v47  ;;  %3387 = vmatmul.msk.bf16.gmra.mxu1 %vm197_vm1, %v4688_v61  ;;  %3450 = vmatmul.msk.bf16.gmra.mxu0 %vm197_vm1, %v4688_v61  ;;  %v2459_v22 = vrot.slane %v1106_v59, 5 }
 0x2df   : > { %v2265_v21 = vsel %vm2052_vm6, %v2262_v48, %v2264_v2  ;;  %v4785_v43 = vadd.f32 %v2089_v54, %v4098_v14 }
 0x2e0   : > { %v2358_v39 = vadd.f32 %v2265_v21, %v4739_v33  ;;  %v2798_v55 = vmax.f32 %v2762_v1, 0.0  ;;  %v4791_v18 = vsel %vm2417_vm5, %v2457_v12, %v2459_v22 }
 0x2e1   : > { %3408 = vmatmul.msk.bf16.gmra.mxu2 %vm197_vm1, %v4688_v61  ;;  %v2930_v61 = vpop.permute.xlu2 %2929 }
 0x2e2   : > { %v3050_v16 = vmul.f32 %v2925_v32, %v2798_v55  ;;  %v2541_v33 = vadd.f32 %v4685_v0, %v2358_v39 }
 0x2e3   : > { %v880_v8 = vpop.f32.mrf.mxu1  ;;  %v1205_v10 = vpop.f32.mrf.mxu0 }
 0x2e4   : > { %v3085_v37 = vadd.f32 %v3084_v44, %v3050_v16  ;;  %v985_v48 = vpop.f32.mrf.mxu2  ;;  %v2723_v34 = vadd.f32 %v2630_v3, %v2541_v33  ;;  %v2090_v11 = vrot.slane %v880_v8, 4  ;;  %v2633_v62 = vrot.slane %v1205_v10, 6 }
 0x2e5   : > { %v2266_v35 = vrot.slane %v985_v48, 4  ;;  %v1109_v50 = vpop.f32.mrf.mxu3 }
 0x2e6   : > { %v2763_v14 = vadd.f32 %v4501_v23, %v2723_v34  ;;  %v2091_v0 = vsel %vm2052_vm6, %v2088_v49, %v2090_v11  ;;  %v2634_v31 = vsel %vm261_vm0, %v2631_v47, %v2633_v62  ;;  %v2461_v12 = vrot.slane %v1109_v50, 5 }
 0x2e7   : > { %v2267_v9 = vsel %vm2052_vm6, %v2264_v2, %v2266_v35  ;;  %v2180_v3 = vadd.f32 %v2091_v0, %v4115_v41  ;;  %v2935_v41 = vpop.permute.xlu0 %2934 }
 0x2e8   : > { %v2359_v56 = vadd.f32 %v2267_v9, %v4755_v5  ;;  %v2799_v38 = vmax.f32 %v2763_v14, 0.0  ;;  %v4801_v44 = vsel %vm2417_vm5, %v2459_v22, %v2461_v12 }
 0x2ea   : > { %v3051_v36 = vmul.f32 %v2930_v61, %v2799_v38  ;;  %v2542_v42 = vadd.f32 %v4705_v25, %v2359_v56 }
 0x2eb   : > { %v883_v19 = vpop.f32.mrf.mxu1  ;;  %v1208_v5 = vpop.f32.mrf.mxu0 }
 0x2ec   : > { %v3086_v20 = vadd.f32 %v3085_v37, %v3051_v36  ;;  %v987_v7 = vpop.f32.mrf.mxu2  ;;  %v2724_v2 = vadd.f32 %v2632_v52, %v2542_v42  ;;  %v2092_v1 = vrot.slane %v883_v19, 4  ;;  %v2635_v49 = vrot.slane %v1208_v5, 6 }
 0x2ed   : > { %v2268_v63 = vrot.slane %v987_v7, 4  ;;  %v1111_v32 = vpop.f32.mrf.mxu3 }
 0x2ee   : > { %v2764_v47 = vadd.f32 %v4501_v23, %v2724_v2  ;;  %v2093_v25 = vsel %vm2052_vm6, %v2090_v11, %v2092_v1  ;;  %v2636_v39 = vsel %vm261_vm0, %v2633_v62, %v2635_v49  ;;  %3388 = vmatmul.msk.bf16.gmra.mxu1 %vm197_vm1, %v4729_v57  ;;  %3451 = vmatmul.msk.bf16.gmra.mxu0 %vm197_vm1, %v4729_v57  ;;  %v2463_v55 = vrot.slane %v1111_v32, 5 }
 0x2ef   : > { %v2269_v21 = vsel %vm2052_vm6, %v2266_v35, %v2268_v63  ;;  %v2181_v52 = vadd.f32 %v2093_v25, %v4128_v15 }
 0x2f0   : > { %v2360_v59 = vadd.f32 %v2269_v21, %v2178_v51  ;;  %v2800_v54 = vmax.f32 %v2764_v47, 0.0  ;;  %v4816_v16 = vsel %vm2417_vm5, %v2461_v12, %v2463_v55 }
 0x2f1   : > { %3409 = vmatmul.msk.bf16.gmra.mxu2 %vm197_vm1, %v4729_v57  ;;  %v2940_v57 = vpop.permute.xlu1 %2939 }
 0x2f2   : > { %v3052_v22 = vmul.f32 %v2935_v41, %v2800_v54  ;;  %v2543_v51 = vadd.f32 %v4726_v4, %v2360_v59 }
 0x2f3   : > { %v885_v35 = vpop.f32.mrf.mxu1  ;;  %v1210_v8 = vpop.f32.mrf.mxu0 }
 0x2f4   : > { %v3087_v33 = vadd.f32 %v3086_v20, %v3052_v22  ;;  %v990_v37 = vpop.f32.mrf.mxu2  ;;  %v2725_v48 = vadd.f32 %v2634_v31, %v2543_v51  ;;  %v2094_v10 = vrot.slane %v885_v35, 4  ;;  %v2637_v11 = vrot.slane %v1210_v8, 6  ;;  %v2950_v35 = vpop.permute.xlu0 %2949 }
 0x2f5   : > { %v2270_v34 = vrot.slane %v990_v37, 4  ;;  %v1114_v14 = vpop.f32.mrf.mxu3 }
 0x2f6   : > { %v2765_v15 = vadd.f32 %v4501_v23, %v2725_v48  ;;  %v2095_v4 = vsel %vm2052_vm6, %v2092_v1, %v2094_v10  ;;  %v2638_v61 = vsel %vm261_vm0, %v2635_v49, %v2637_v11  ;;  %v2465_v0 = vrot.slane %v1114_v14, 5 }
 0x2f7   : > { %v2271_v62 = vsel %vm2052_vm6, %v2268_v63, %v2270_v34  ;;  %v2182_v56 = vadd.f32 %v2095_v4, %v4144_v53  ;;  %v2945_v53 = vpop.permute.xlu2 %2944 }
 0x2f8   : > { %v2361_v9 = vadd.f32 %v2271_v62, %v4785_v43  ;;  %v2801_v50 = vmax.f32 %v2765_v15, 0.0  ;;  %v4826_v12 = vsel %vm2417_vm5, %v2463_v55, %v2465_v0 }
 0x2fa   : > { %v3053_v31 = vmul.f32 %v2940_v57, %v2801_v50  ;;  %v2544_v38 = vadd.f32 %v4743_v24, %v2361_v9 }
 0x2fb   : > { %v888_v2 = vpop.f32.mrf.mxu1  ;;  %v1213_v43 = vpop.f32.mrf.mxu0 }
 0x2fc   : > { %v3088_v36 = vadd.f32 %v3087_v33, %v3053_v31  ;;  %v992_v42 = vpop.f32.mrf.mxu2  ;;  %v2726_v20 = vadd.f32 %v2636_v39, %v2544_v38  ;;  %v2096_v63 = vrot.slane %v888_v2, 4  ;;  %v2639_v19 = vrot.slane %v1213_v43, 6 }
 0x2fd   : > { %v2272_v7 = vrot.slane %v992_v42, 4  ;;  %v1116_v49 = vpop.f32.mrf.mxu3 }
 0x2fe   : > { %v2766_v5 = vadd.f32 %v4501_v23, %v2726_v20  ;;  %v2097_v24 = vsel %vm2052_vm6, %v2094_v10, %v2096_v63  ;;  %v2640_v21 = vsel %vm261_vm0, %v2637_v11, %v2639_v19  ;;  %3452 = vmatmul.msk.bf16.gmra.mxu0 %vm197_vm1, %v3660_v26  ;;  %3389 = vmatmul.msk.bf16.gmra.mxu1 %vm197_vm1, %v3660_v26 }
 0x2ff   : > { %v2273_v1 = vsel %vm2052_vm6, %v2270_v34, %v2272_v7  ;;  %v2183_v32 = vadd.f32 %v2097_v24, %v4158_v28  ;;  %v2467_v28 = vrot.slane %v1116_v49, 5 }
 0x300   : > { %v2362_v47 = vadd.f32 %v2273_v1, %v2180_v3  ;;  %v2802_v41 = vmax.f32 %v2766_v5, 0.0 }
 0x301   : > { %3410 = vmatmul.msk.bf16.gmra.mxu2 %vm197_vm1, %v3660_v26  ;;  %v4846_v62 = vsel %vm2417_vm5, %v2465_v0, %v2467_v28 }
 0x302   : > { %v3054_v59 = vmul.f32 %v2945_v53, %v2802_v41  ;;  %v2545_v25 = vadd.f32 %v4761_v40, %v2362_v47 }
 0x303   : > { %v890_v22 = vpop.f32.mrf.mxu1  ;;  %v1215_v51 = vpop.f32.mrf.mxu0 }
 0x304   : > { %v3089_v3 = vadd.f32 %v3088_v36, %v3054_v59  ;;  %v995_v39 = vpop.f32.mrf.mxu2  ;;  %v2727_v54 = vadd.f32 %v2638_v61, %v2545_v25  ;;  %v2098_v33 = vrot.slane %v890_v22, 4  ;;  %v2641_v37 = vrot.slane %v1215_v51, 6 }
 0x305   : > { %v2274_v55 = vrot.slane %v995_v39, 4  ;;  %v1119_v8 = vpop.f32.mrf.mxu3 }
 0x306   : > { %v2767_v48 = vadd.f32 %v4501_v23, %v2727_v54  ;;  %v2099_v26 = vsel %vm2052_vm6, %v2096_v63, %v2098_v33  ;;  %v2642_v40 = vsel %vm261_vm0, %v2639_v19, %v2641_v37  ;;  %v2469_v57 = vrot.slane %v1119_v8, 5 }
 0x307   : > { %v2275_v34 = vsel %vm2052_vm6, %v2272_v7, %v2274_v55  ;;  %v2184_v15 = vadd.f32 %v2099_v26, %v4175_v45  ;;  %v2955_v7 = vpop.permute.xlu1 %2954 }
 0x308   : > { %v2363_v10 = vadd.f32 %v2275_v34, %v2181_v52  ;;  %v2803_v11 = vmax.f32 %v2767_v48, 0.0  ;;  %v4850_v4 = vsel %vm2417_vm5, %v2467_v28, %v2469_v57 }
 0x30a   : > { %v3055_v14 = vmul.f32 %v2950_v35, %v2803_v11  ;;  %v2546_v9 = vadd.f32 %v4773_v27, %v2363_v10 }
 0x30b   : > { %v893_v38 = vpop.f32.mrf.mxu1  ;;  %v1218_v36 = vpop.f32.mrf.mxu0 }
 0x30c   : > { %v3090_v61 = vadd.f32 %v3089_v3, %v3055_v14  ;;  %v997_v50 = vpop.f32.mrf.mxu2  ;;  %v2728_v52 = vadd.f32 %v2640_v21, %v2546_v9  ;;  %v2100_v42 = vrot.slane %v893_v38, 4  ;;  %v2643_v20 = vrot.slane %v1218_v36, 6  ;;  %v2965_v36 = vpop.permute.xlu0 %2964 }
 0x30d   : > { %v2276_v31 = vrot.slane %v997_v50, 4  ;;  %v1121_v2 = vpop.f32.mrf.mxu3 }
 0x30e   : > { %v2768_v45 = vadd.f32 %v4501_v23, %v2728_v52  ;;  %v2101_v27 = vsel %vm2052_vm6, %v2098_v33, %v2100_v42  ;;  %v2644_v63 = vsel %vm261_vm0, %v2641_v37, %v2643_v20  ;;  %v2471_v54 = vrot.slane %v1121_v2, 5  ;;  %v2960_v33 = vpop.permute.xlu2 %2959 }
 0x30f   : > { %v2277_v0 = vsel %vm2052_vm6, %v2274_v55, %v2276_v31  ;;  %v2185_v5 = vadd.f32 %v2101_v27, %v4189_v29 }
 0x310   : > { %v2364_v43 = vadd.f32 %v2277_v0, %v2182_v56  ;;  %v2804_v19 = vmax.f32 %v2768_v45, 0.0  ;;  %v4864_v48 = vsel %vm2417_vm5, %v2469_v57, %v2471_v54 }
 0x312   : > { %v3056_v1 = vmul.f32 %v2955_v7, %v2804_v19  ;;  %v2547_v53 = vadd.f32 %v4791_v18, %v2364_v43 }
 0x313   : > { %v895_v41 = vpop.f32.mrf.mxu1  ;;  %v1220_v59 = vpop.f32.mrf.mxu0 }
 0x314   : > { %v3091_v49 = vadd.f32 %v3090_v61, %v3056_v1  ;;  %v2729_v47 = vadd.f32 %v2642_v40, %v2547_v53  ;;  %v1000_v24 = vpop.f32.mrf.mxu2  ;;  %v2102_v3 = vrot.slane %v895_v41, 4  ;;  %v2645_v56 = vrot.slane %v1220_v59, 6  ;;  %v2970_v41 = vpop.permute.xlu1 %2969 }
 0x315   : > { %v2278_v21 = vrot.slane %v1000_v24, 4  ;;  %v1124_v55 = vpop.f32.mrf.mxu3 }
 0x316   : > { %v2769_v25 = vadd.f32 %v4501_v23, %v2729_v47  ;;  %v2103_v29 = vsel %vm2052_vm6, %v2100_v42, %v2102_v3  ;;  %v2646_v18 = vsel %vm261_vm0, %v2643_v20, %v2645_v56  ;;  %v2473_v34 = vrot.slane %v1124_v55, 5 }
 0x317   : > { %v2279_v39 = vsel %vm2052_vm6, %v2276_v31, %v2278_v21  ;;  %v2186_v37 = vadd.f32 %v2103_v29, %v4206_v30 }
 0x318   : > { %v2805_v22 = vmax.f32 %v2769_v25, 0.0  ;;  %v2365_v51 = vadd.f32 %v2279_v39, %v2183_v32  ;;  %v4868_v8 = vsel %vm2417_vm5, %v2471_v54, %v2473_v34 }
 0x31a   : > { %v3057_v35 = vmul.f32 %v2960_v33, %v2805_v22  ;;  %v2548_v28 = vadd.f32 %v4801_v44, %v2365_v51 }
 0x31b   : > { %v898_v11 = vpop.f32.mrf.mxu1  ;;  %v1223_v14 = vpop.f32.mrf.mxu0 }
 0x31c   : > { %v3092_v10 = vadd.f32 %v3091_v49, %v3057_v35  ;;  %v2730_v26 = vadd.f32 %v2644_v63, %v2548_v28  ;;  %v1002_v32 = vpop.f32.mrf.mxu2  ;;  %v2104_v61 = vrot.slane %v898_v11, 4  ;;  %v2647_v30 = vrot.slane %v1223_v14, 6 }
 0x31d   : > { %v2280_v40 = vrot.slane %v1002_v32, 4  ;;  %v1126_v50 = vpop.f32.mrf.mxu3 }
 0x31e   : > { %v2770_v9 = vadd.f32 %v4501_v23, %v2730_v26  ;;  %v2105_v44 = vsel %vm2052_vm6, %v2102_v3, %v2104_v61  ;;  %v2648_v38 = vsel %vm261_vm0, %v2645_v56, %v2647_v30  ;;  %v2475_v53 = vrot.slane %v1126_v50, 5 }
 0x31f   : > { %v2281_v57 = vsel %vm2052_vm6, %v2278_v21, %v2280_v40  ;;  %v2187_v42 = vadd.f32 %v2105_v44, %v4220_v6 }
 0x320   : > { %v2806_v52 = vmax.f32 %v2770_v9, 0.0  ;;  %v2366_v31 = vadd.f32 %v2281_v57, %v2184_v15  ;;  %v4879_v15 = vld [vmem:[%s5063_s2] ss:$0 sm:$0xff]  ;;  %v4887_v25 = vsel %vm2417_vm5, %v2473_v34, %v2475_v53 }
 0x322   : > { %v3058_v20 = vmul.f32 %v2965_v36, %v2806_v52  ;;  %v2549_v45 = vadd.f32 %v4816_v16, %v2366_v31 }
 0x323   : > { %v900_v43 = vpop.f32.mrf.mxu1  ;;  %v1225_v27 = vpop.f32.mrf.mxu0 }
 0x324   : > { %v3093_v0 = vadd.f32 %v3092_v10, %v3058_v20  ;;  %v2731_v7 = vadd.f32 %v2646_v18, %v2549_v45  ;;  %v1005_v23 = vpop.f32.mrf.mxu2  ;;  %v2106_v19 = vrot.slane %v900_v43, 4  ;;  %v2649_v1 = vrot.slane %v1225_v27, 6 }
 0x325   : > { %v2282_v2 = vrot.slane %v1005_v23, 4  ;;  %v1129_v49 = vpop.f32.mrf.mxu3  ;;  %v2980_v23 = vpop.permute.xlu0 %2979 }
 0x326   : > { %v2771_v63 = vadd.f32 %v4879_v15, %v2731_v7  ;;  %v2107_v24 = vsel %vm2052_vm6, %v2104_v61, %v2106_v19  ;;  %v2650_v21 = vsel %vm261_vm0, %v2647_v30, %v2649_v1  ;;  %v2477_v3 = vrot.slane %v1129_v49, 5 }
 0x327   : > { %v2283_v6 = vsel %vm2052_vm6, %v2280_v40, %v2282_v2  ;;  %v2188_v59 = vadd.f32 %v2107_v24, %v4237_v13  ;;  %v2975_v40 = vpop.permute.xlu2 %2974 }
 0x328   : > { %v2807_v16 = vmax.f32 %v2771_v63, 0.0  ;;  %v2367_v47 = vadd.f32 %v2283_v6, %v2185_v5  ;;  %v4891_v54 = vsel %vm2417_vm5, %v2475_v53, %v2477_v3 }
 0x32a   : > { %v3059_v56 = vmul.f32 %v2970_v41, %v2807_v16  ;;  %v2550_v39 = vadd.f32 %v4826_v12, %v2367_v47 }
 0x32b   : > { %v903_v29 = vpop.f32.mrf.mxu1  ;;  %v1228_v18 = vpop.f32.mrf.mxu0 }
 0x32c   : > { %v3094_v55 = vadd.f32 %v3093_v0, %v3059_v56  ;;  %v2732_v22 = vadd.f32 %v2648_v38, %v2550_v39  ;;  %v1007_v5 = vpop.f32.mrf.mxu2  ;;  %v2108_v35 = vrot.slane %v903_v29, 4  ;;  %v2651_v13 = vrot.slane %v1228_v18, 6  ;;  %v2985_v39 = vpop.permute.xlu1 %2984 }
 0x32d   : > { %v2284_v51 = vrot.slane %v1007_v5, 4  ;;  %v1131_v28 = vpop.f32.mrf.mxu3 }
 0x32e   : > { %v2772_v33 = vadd.f32 %v4879_v15, %v2732_v22  ;;  %v2109_v12 = vsel %vm2052_vm6, %v2106_v19, %v2108_v35  ;;  %v2652_v32 = vsel %vm261_vm0, %v2649_v1, %v2651_v13  ;;  %v2479_v20 = vrot.slane %v1131_v28, 5 }
 0x32f   : > { %v2285_v34 = vsel %vm2052_vm6, %v2282_v2, %v2284_v51  ;;  %v2189_v11 = vadd.f32 %v2109_v12, %v4251_v46 }
 0x330   : > { %v2808_v10 = vmax.f32 %v2772_v33, 0.0  ;;  %v2368_v26 = vadd.f32 %v2285_v34, %v2186_v37  ;;  %v4905_v43 = vsel %vm2417_vm5, %v2477_v3, %v2479_v20 }
 0x332   : > { %v3060_v14 = vmul.f32 %v2975_v40, %v2808_v10  ;;  %v2551_v9 = vadd.f32 %v4846_v62, %v2368_v26 }
 0x333   : > { %v905_v52 = vpop.f32.mrf.mxu1  ;;  %v1230_v31 = vpop.f32.mrf.mxu0 }
 0x334   : > { %v3095_v61 = vadd.f32 %v3094_v55, %v3060_v14  ;;  %v2733_v30 = vadd.f32 %v2650_v21, %v2551_v9  ;;  %v1010_v57 = vpop.f32.mrf.mxu2  ;;  %v2110_v38 = vrot.slane %v905_v52, 4  ;;  %v2653_v37 = vrot.slane %v1230_v31, 6 }
 0x335   : > { %v2286_v50 = vrot.slane %v1010_v57, 4  ;;  %v1134_v45 = vpop.f32.mrf.mxu3 }
 0x336   : > { %v2773_v44 = vadd.f32 %v4879_v15, %v2733_v30  ;;  %v2111_v46 = vsel %vm2052_vm6, %v2108_v35, %v2110_v38  ;;  %v2654_v62 = vsel %vm261_vm0, %v2651_v13, %v2653_v37  ;;  %v2481_v27 = vrot.slane %v1134_v45, 5 }
 0x337   : > { %v2287_v36 = vsel %vm2052_vm6, %v2284_v51, %v2286_v50  ;;  %v2190_v2 = vadd.f32 %v2111_v46, %v4271_v17 }
 0x338   : > { %v2809_v0 = vmax.f32 %v2773_v44, 0.0  ;;  %v2369_v7 = vadd.f32 %v2287_v36, %v2187_v42  ;;  %v4909_v1 = vsel %vm2417_vm5, %v2479_v20, %v2481_v27 }
 0x33a   : > { %v3061_v63 = vmul.f32 %v2980_v23, %v2809_v0  ;;  %v2552_v19 = vadd.f32 %v4850_v4, %v2369_v7  ;;  %v2995_v0 = vpop.permute.xlu0 %2994 }
 0x33b   : > { %v4911_v16 = vpop.f32.mrf.mxu1  ;;  %v1233_v47 = vpop.f32.mrf.mxu0 }
 0x33c   : > { %v3096_v6 = vadd.f32 %v3095_v61, %v3061_v63  ;;  %v2734_v53 = vadd.f32 %v2652_v32, %v2552_v19  ;;  %v1012_v42 = vpop.f32.mrf.mxu2  ;;  %v2112_v17 = vrot.slane %v4911_v16, 4  ;;  %v2655_v28 = vrot.slane %v1233_v47, 6  ;;  %v2990_v32 = vpop.permute.xlu2 %2989 }
 0x33d   : > { %v2288_v49 = vrot.slane %v1012_v42, 4  ;;  %v4916_v41 = vpop.f32.mrf.mxu3  ;;  %v3000_v47 = vpop.permute.xlu1 %2999 }
 0x33e   : > { %v2774_v24 = vadd.f32 %v4879_v15, %v2734_v53  ;;  %v2113_v56 = vsel %vm2052_vm6, %v2110_v38, %v2112_v17  ;;  %v2483_v10 = vrot.slane %v4916_v41, 5  ;;  %v2656_v9 = vsel %vm261_vm0, %v2653_v37, %v2655_v28 }
 0x33f   : > { %v2289_v21 = vsel %vm2052_vm6, %v2286_v50, %v2288_v49  ;;  %v2191_v55 = vadd.f32 %v2113_v56, %v4291_v58 }
 0x340   : > { %v2810_v3 = vmax.f32 %v2774_v24, 0.0  ;;  %v2370_v4 = vadd.f32 %v2289_v21, %v2188_v59 }
 0x342   : > { %v3062_v22 = vmul.f32 %v2985_v39, %v2810_v3  ;;  %v2553_v5 = vadd.f32 %v4864_v48, %v2370_v4  ;;  %v4931_v48 = vsel %vm2417_vm5, %v2481_v27, %v2483_v10 }
 0x343   : > { %v4921_v35 = vpop.f32.mrf.mxu1  ;;  %v1235_v13 = vpop.f32.mrf.mxu0 }
 0x344   : > { %v3097_v51 = vadd.f32 %v3096_v6, %v3062_v22  ;;  %v2735_v29 = vadd.f32 %v2654_v62, %v2553_v5  ;;  %v1015_v18 = vpop.f32.mrf.mxu2  ;;  %v2657_v44 = vrot.slane %v1235_v13, 6  ;;  %v2114_v53 = vrot.slane %v4921_v35, 4 }
 0x345   : > { %v2290_v33 = vrot.slane %v1015_v18, 4  ;;  %v4926_v26 = vpop.f32.mrf.mxu3 }
 0x346   : > { %v2775_v34 = vadd.f32 %v4879_v15, %v2735_v29  ;;  %v2658_v7 = vsel %vm261_vm0, %v2655_v28, %v2657_v44  ;;  %v2115_v3 = vsel %vm2052_vm6, %v2112_v17, %v2114_v53  ;;  %v3005_v28 = vpop.permute.xlu2 %3004 }
 0x347   : > { %v2291_v59 = vsel %vm2052_vm6, %v2288_v49, %v2290_v33  ;;  %v2192_v18 = vadd.f32 %v2115_v3, %v4313_v60 }
 0x348   : > { %v2811_v58 = vmax.f32 %v2775_v34, 0.0  ;;  %v2371_v12 = vadd.f32 %v2291_v59, %v2189_v11 }
 0x34a   : > { %v3063_v40 = vmul.f32 %v2990_v32, %v2811_v58  ;;  %v2554_v14 = vadd.f32 %v4868_v8, %v2371_v12 }
 0x34b   : > { %v4935_v52 = vpop.f32.mrf.mxu1  ;;  %v1238_v31 = vpop.f32.mrf.mxu0 }
 0x34c   : > { %v3098_v61 = vadd.f32 %v3097_v51, %v3063_v40  ;;  %v2736_v30 = vadd.f32 %v2656_v9, %v2554_v14  ;;  %v1017_v57 = vpop.f32.mrf.mxu2  ;;  %v2659_v42 = vrot.slane %v1238_v31, 6 }
 0x34d   : > { %v2292_v50 = vrot.slane %v1017_v57, 4  ;;  %v4939_v36 = vpop.f32.mrf.mxu3  ;;  %v5091_v57 = vld [vmem:[#allocation6_spill] sm:$0xff] }
 0x34e   : > { %v2776_v11 = vadd.f32 %v4879_v15, %v2736_v30  ;;  %v2660_v4 = vsel %vm261_vm0, %v2657_v44, %v2659_v42 }
 0x34f   : > { %v2293_v38 = vsel %vm2052_vm6, %v2290_v33, %v2292_v50 }
 0x350   : > { %v2812_v20 = vmax.f32 %v2776_v11, 0.0  ;;  %v2372_v45 = vadd.f32 %v2293_v38, %v2190_v2 }
 0x352   : > { %v3064_v8 = vmul.f32 %v2995_v0, %v2812_v20  ;;  %v2555_v37 = vadd.f32 %v4887_v25, %v2372_v45  ;;  %v3010_v20 = vpop.permute.xlu0 %3009 }
 0x353   : > { %v4943_v63 = vpop.f32.mrf.mxu1  ;;  %v1240_v19 = vpop.f32.mrf.mxu0 }
 0x354   : > { %v3099_v46 = vadd.f32 %v3098_v61, %v3064_v8  ;;  %v2737_v62 = vadd.f32 %v2658_v7, %v2555_v37  ;;  %v1020_v23 = vpop.f32.mrf.mxu2  ;;  %v2661_v35 = vrot.slane %v1240_v19, 6  ;;  %v2118_v31 = vrot.slane %v4943_v63, 4  ;;  %v5092_v63 = vld [vmem:[#allocation7_spill] sm:$0xff] }
 0x355   : > { %v2294_v27 = vrot.slane %v1020_v23, 4  ;;  %v4948_v49 = vpop.f32.mrf.mxu3 }
 0x356   : > { %v2777_v6 = vadd.f32 %v4879_v15, %v2737_v62  ;;  %v2662_v32 = vsel %vm261_vm0, %v2659_v42, %v2661_v35 }
 0x357   : > { %v2295_v2 = vsel %vm2052_vm6, %v2292_v50, %v2294_v27 }
 0x358   : > { %v2813_v16 = vmax.f32 %v2777_v6, 0.0  ;;  %v2373_v25 = vadd.f32 %v2295_v2, %v2191_v55  ;;  %v2116_v55 = vrot.slane %v4935_v52, 4 }
 0x35a   : > { %v3065_v24 = vmul.f32 %v3000_v47, %v2813_v16  ;;  %v2556_v21 = vadd.f32 %v4891_v54, %v2373_v25  ;;  %v2117_v12 = vsel %vm2052_vm6, %v2114_v53, %v2116_v55  ;;  %v2119_v8 = vsel %vm2052_vm6, %v2116_v55, %v2118_v31  ;;  %v3015_v47 = vpop.permute.xlu1 %3014 }
 0x35b   : > { %v4953_v51 = vpop.f32.mrf.mxu1  ;;  %v1243_v29 = vpop.f32.mrf.mxu0  ;;  %v2193_v50 = vadd.f32 %v2117_v12, %v5091_v57  ;;  %v2194_v6 = vadd.f32 %v2119_v8, %v5092_v63  ;;  %v5095_v63 = vld [vmem:[#allocation10_spill] sm:$0xff] }
 0x35c   : > { %v3100_v56 = vadd.f32 %v3099_v46, %v3065_v24  ;;  %v2738_v39 = vadd.f32 %v2660_v4, %v2556_v21  ;;  %v1022_v22 = vpop.f32.mrf.mxu2  ;;  %v2663_v11 = vrot.slane %v1243_v29, 6  ;;  %v2120_v42 = vrot.slane %v4953_v51, 4 }
 0x35d   : > { %v2296_v5 = vrot.slane %v1022_v22, 4  ;;  %v1146_v13 = vpop.f32.mrf.mxu3 }
 0x35e   : > { %v2778_v33 = vadd.f32 %v4879_v15, %v2738_v39  ;;  %v2664_v37 = vsel %vm261_vm0, %v2661_v35, %v2663_v11  ;;  %v2121_v3 = vsel %vm2052_vm6, %v2118_v31, %v2120_v42 }
 0x35f   : > { %v2297_v54 = vsel %vm2052_vm6, %v2294_v27, %v2296_v5 }
 0x360   : > { %v2814_v17 = vmax.f32 %v2778_v33, 0.0  ;;  %v2374_v34 = vadd.f32 %v2297_v54, %v2192_v18  ;;  %v5093_v33 = vld [vmem:[#allocation8_spill] sm:$0xff] }
 0x361   : > { %v2195_v55 = vadd.f32 %v2121_v3, %v5093_v33 }
 0x362   : > { %v3066_v59 = vmul.f32 %v3005_v28, %v2814_v17  ;;  %v2557_v58 = vadd.f32 %v4905_v43, %v2374_v34  ;;  %v3020_v28 = vpop.permute.xlu2 %3019 }
 0x363   : > { %v4962_v61 = vpop.f32.mrf.mxu1  ;;  %v1245_v30 = vpop.f32.mrf.mxu0 }
 0x364   : > { %v3101_v40 = vadd.f32 %v3100_v56, %v3066_v59  ;;  %v2739_v60 = vadd.f32 %v2662_v32, %v2557_v58  ;;  %v1025_v14 = vpop.f32.mrf.mxu2  ;;  %v2665_v2 = vrot.slane %v1245_v30, 6  ;;  %v2122_v54 = vrot.slane %v4962_v61, 4 }
 0x365   : > { %v2298_v9 = vrot.slane %v1025_v14, 4 }
 0x366   : > { %v2779_v52 = vadd.f32 %v4879_v15, %v2739_v60  ;;  %v2666_v4 = vsel %vm261_vm0, %v2663_v11, %v2665_v2  ;;  %v2123_v12 = vsel %vm2052_vm6, %v2120_v42, %v2122_v54 }
 0x367   : > { %v2299_v43 = vsel %vm2052_vm6, %v2296_v5, %v2298_v9  ;;  %v2485_v5 = vrot.slane %v4926_v26, 5 }
 0x368   : > { %v2815_v44 = vmax.f32 %v2779_v52, 0.0  ;;  %v2375_v38 = vadd.f32 %v2299_v43, %v2193_v50  ;;  %v5094_v50 = vld [vmem:[#allocation9_spill] sm:$0xff] }
 0x369   : > { %v2486_v59 = vsel %vm2417_vm5, %v2483_v10, %v2485_v5  ;;  %v2196_v52 = vadd.f32 %v2123_v12, %v5094_v50  ;;  %v3126_v12 = vld [vmem:[%s5065_s4 + $0x40] sm:$0xff] (%p27_p0) }
 0x36a   : > { %v3067_v45 = vmul.f32 %v3010_v20, %v2815_v44  ;;  %v2558_v0 = vadd.f32 %v4909_v1, %v2375_v38  ;;  %v3025_v38 = vpop.permute.xlu0 %3024 }
 0x36b   : > { %v923_v27 = vpop.f32.mrf.mxu1  ;;  %v1248_v19 = vpop.f32.mrf.mxu0 }
 0x36c   : > { %v3102_v7 = vadd.f32 %v3101_v40, %v3067_v45  ;;  %v2740_v46 = vadd.f32 %v2664_v37, %v2558_v0  ;;  %v1027_v62 = vpop.f32.mrf.mxu2  ;;  %v2667_v13 = vrot.slane %v1248_v19, 6  ;;  %v2124_v31 = vrot.slane %v923_v27, 4 }
 0x36d   : > { %v2300_v23 = vrot.slane %v1027_v62, 4  ;;  %v2489_v62 = vrot.slane %v4948_v49, 5 }
 0x36e   : > { %v2780_v53 = vadd.f32 %v4879_v15, %v2740_v46  ;;  %v2668_v32 = vsel %vm261_vm0, %v2665_v2, %v2667_v13 }
 0x36f   : > { %v2301_v16 = vsel %vm2052_vm6, %v2298_v9, %v2300_v23  ;;  %v2487_v9 = vrot.slane %v4939_v36, 5  ;;  %v2125_v36 = vsel %vm2052_vm6, %v2122_v54, %v2124_v31 }
 0x370   : > { %v2816_v1 = vmax.f32 %v2780_v53, 0.0  ;;  %v2376_v25 = vadd.f32 %v2301_v16, %v2194_v6  ;;  %v2197_v6 = vadd.f32 %v2125_v36, %v5095_v63 }
 0x371   : > { %v2488_v20 = vsel %vm2417_vm5, %v2485_v5, %v2487_v9  ;;  %v3035_v5 = vpop.permute.xlu2 %3034 }
 0x372   : > { %v3068_v24 = vmul.f32 %v3015_v47, %v2816_v1  ;;  %v2559_v21 = vadd.f32 %v4931_v48, %v2376_v25  ;;  %v3030_v25 = vpop.permute.xlu1 %3029  ;;  %v2490_v47 = vsel %vm2417_vm5, %v2487_v9, %v2489_v62  ;;  %v3121_v9 = vld [vmem:[%s5065_s4 + $0x18] sm:$0xff] (%p27_p0) }
 0x373   : > { %v1250_v51 = vpop.f32.mrf.mxu0  ;;  %v925_v18 = vpop.f32.mrf.mxu1 }
 0x374   : > { %v3103_v56 = vadd.f32 %v3102_v7, %v3068_v24  ;;  %v2741_v39 = vadd.f32 %v2666_v4, %v2559_v21  ;;  %v1030_v22 = vpop.f32.mrf.mxu2  ;;  %v2669_v10 = vrot.slane %v1250_v51, 6 }
 0x375   : > { %v2302_v29 = vrot.slane %v1030_v22, 4 }
 0x376   : > { %v2781_v35 = vadd.f32 %v4879_v15, %v2741_v39  ;;  %v2670_v8 = vsel %vm261_vm0, %v2667_v13, %v2669_v10 }
 0x377   : > { %v2303_v48 = vsel %vm2052_vm6, %v2300_v23, %v2302_v29 }
 0x378   : > { %v2817_v17 = vmax.f32 %v2781_v35, 0.0  ;;  %v2377_v34 = vadd.f32 %v2303_v48, %v2195_v55 }
 0x37a   : > { %v3069_v26 = vmul.f32 %v3020_v28, %v2817_v17  ;;  %v2560_v58 = vadd.f32 %v2486_v59, %v2377_v34  ;;  %v3132_v17 = vld [vmem:[%s5065_s4 + $0x70] sm:$0xff] (%p27_p0)  ;;  %v3131_v34 = vld [vmem:[%s5065_s4 + $0x68] sm:$0xff] (%p27_p0)  ;;  %v3130_v28 = vld [vmem:[%s5065_s4 + $0x60] sm:$0xff] (%p27_p0) }
 0x37b   : > { %v1253_v30 = vpop.f32.mrf.mxu0  ;;  %v927_v57 = vpop.f32.mrf.mxu1  ;;  %v3129_v59 = vld [vmem:[%s5065_s4 + $0x58] sm:$0xff] (%p27_p0) }
 0x37c   : > { %v3104_v40 = vadd.f32 %v3103_v56, %v3069_v26  ;;  %v2742_v60 = vadd.f32 %v2668_v32, %v2560_v58  ;;  %v1032_v14 = vpop.f32.mrf.mxu2  ;;  %v2671_v42 = vrot.slane %v1253_v30, 6  ;;  %v3128_v26 = vld [vmem:[%s5065_s4 + $0x50] sm:$0xff] (%p27_p0)  ;;  %v3127_v58 = vld [vmem:[%s5065_s4 + $0x48] sm:$0xff] (%p27_p0)  ;;  %v3125_v32 = vld [vmem:[%s5065_s4 + $0x38] sm:$0xff] (%p27_p0) }
 0x37d   : > { %v2304_v61 = vrot.slane %v1032_v14, 4  ;;  %v3122_v14 = vld [vmem:[%s5065_s4 + $0x20] sm:$0xff] (%p27_p0)  ;;  %v3119_v30 = vld [vmem:[%s5065_s4 + $0x8] sm:$0xff] (%p27_p0) }
 0x37e   : > { %v2782_v41 = vadd.f32 %v4879_v15, %v2742_v60  ;;  %v2672_v3 = vsel %vm261_vm0, %v2669_v10, %v2671_v42  ;;  %v3123_v60 = vld [vmem:[%s5065_s4 + $0x28] sm:$0xff] (%p27_p0)  ;;  %v3118_v57 = vld [vmem:[%s5065_s4] sm:$0xff] (%p27_p0) }
 0x37f   : > { %v2305_v11 = vsel %vm2052_vm6, %v2302_v29, %v2304_v61 }
 0x380   : > { %v2818_v43 = vmax.f32 %v2782_v41, 0.0  ;;  %v2378_v44 = vadd.f32 %v2305_v11, %v2196_v52  ;;  %v3513_v52 = vld [vmem:[%s5066_s5] ss:$0 sm:$0xff] (%p27_p0) }
 0x382   : > { %v3070_v45 = vmul.f32 %v3025_v38, %v2818_v43  ;;  %v2561_v0 = vadd.f32 %v2488_v20, %v2378_v44 }
 0x383   : > { %v1255_v27 = vpop.f32.mrf.mxu0  ;;  %v928_v19 = vpop.f32.mrf.mxu1 }
 0x384   : > { %v3105_v37 = vadd.f32 %v3104_v40, %v3070_v45  ;;  %v2743_v7 = vadd.f32 %v2670_v8, %v2561_v0  ;;  %v1035_v46 = vpop.f32.mrf.mxu2  ;;  %v3124_v40 = vld [vmem:[%s5065_s4 + $0x30] sm:$0xff] (%p27_p0) }
 0x385   : > { %v2306_v23 = vrot.slane %v1035_v46, 4 }
 0x386   : > { %v2783_v53 = vadd.f32 %v4879_v15, %v2743_v7 }
 0x387   : > { %v2307_v2 = vsel %vm2052_vm6, %v2304_v61, %v2306_v23  ;;  %v3120_v61 = vld [vmem:[%s5065_s4 + $0x10] sm:$0xff] (%p27_p0) }
 0x388   : > { %v2819_v16 = vmax.f32 %v2783_v53, 0.0  ;;  %v2379_v1 = vadd.f32 %v2307_v2, %v2197_v6 }
 0x38a   : > { %v3071_v24 = vmul.f32 %v3030_v25, %v2819_v16  ;;  %v2562_v21 = vadd.f32 %v2490_v47, %v2379_v1 }
 0x38c   : > { %v3106_v49 = vadd.f32 %v3105_v37, %v3071_v24  ;;  %v2744_v4 = vadd.f32 %v2672_v3, %v2562_v21  ;;  %v1037_v56 = vpop.f32.mrf.mxu2 }
 0x38e   : > { %v2784_v39 = vadd.f32 %v4879_v15, %v2744_v4  ;;  %v3133_v15 = vld [vmem:[%s5065_s4 + $0x78] sm:$0xff] (%p27_p0) }
 0x38f   :  { %3138 = vmatpush.msra.mxu0 (%p27_p0), %v3133_v15 }
 0x390   : > { %v2820_v22 = vmax.f32 %v2784_v39, 0.0 }
 0x391   :  { %3139 = vmatpush.msra.mxu0 (%p27_p0), %v3132_v17 }
 0x392   : > { %v3072_v29 = vmul.f32 %v3035_v5, %v2820_v22 }
 0x393   :  { %3140 = vmatpush.msra.mxu0 (%p27_p0), %v3131_v34 }
 0x394   : > { %v3107_v51 = vsel %vm1509_vm2, %v3072_v29, 0.0 }
 0x395   : > { %v3108_v18 = vadd.f32 %v3107_v51, %v3106_v49  ;;  %3141 = vmatpush.msra.mxu0 (%p27_p0), %v3130_v28 }
 0x397   : > { %v3109_v33 = vrot.slane %v3108_v18, 4  ;;  %3142 = vmatpush.msra.mxu0 (%p27_p0), %v3129_v59 }
 0x399   : > { %v3110_v55 = vadd.f32 %v3109_v33, %v3108_v18  ;;  %3143 = vmatpush.msra.mxu0 (%p27_p0), %v3128_v26 }
 0x39b   : > { %v3111_v35 = vrot.slane %v3110_v55, 2  ;;  %3144 = vmatpush.msra.mxu0 (%p27_p0), %v3127_v58 }
 0x39d   : > { %v3112_v54 = vadd.f32 %v3111_v35, %v3110_v55  ;;  %3145 = vmatpush.msra.mxu0 (%p27_p0), %v3126_v12 }
 0x39f   : > { %v3113_v13 = vrot.slane %v3112_v54, 1  ;;  %29 = sbr.rel (!%p27_p0) target bundleno = 1 (0x1), region = 54  ;;  %3146 = vmatpush.msra.mxu0 (%p27_p0), %v3125_v32 }
 0x3a1   : > { %v3114_v48 = vadd.f32 %v3113_v13, %v3112_v54  ;;  %3147 = vmatpush.msra.mxu0 (%p27_p0), %v3124_v40 }
 0x3a3   : > { %3116 = vst [vmem:[%s3115_s17] sm:$0x1] %v3114_v48  ;;  %3148 = vmatpush.msra.mxu0 (%p27_p0), %v3123_v60 }
 0x3a5   :  { %3149 = vmatpush.msra.mxu0 %v3122_v14 }
 0x3a7   :  { %3150 = vmatpush.msra.mxu0 %v3121_v9 }
 0x3a9   :  { %3151 = vmatpush.msra.mxu0 %v3120_v61 }
 0x3aa   :  { %v3117_v50 = vld [vmem:[#allocation2] sm:$0x3] }
 0x3ab   :  { %3152 = vmatpush.msra.mxu0 %v3119_v30 }
 0x3ad   :  { %3153 = vmatpush.msra.mxu0 %v3118_v57 }
 0x3ae   :  { %3154 = vmatmul.f32.vlgmr.msra.gmra.mxu0 %v3117_v50 }
 0x42b   :  { %v3155_v41 = vpop.f32.mrf.mxu0 }
 0x42c   :  { %v3156_v31 = vadd.f32 %v3513_v52, %v3155_v41 }
 0x42e   :  { %3158 = vst [vmem:[#allocation3] sm:$0x3] %v3156_v31 }
 0x42f   :  { %3169 = dma.vmem_to_hbm [thread:$0]  %s3165_s26, 32, %s3167_s1, [#allocation4]  }
 0x430   :  { %3542 = dma.done.wait [#allocation4], 32  }
 0x431   :  { %3543 = vsyncadd [#allocation4], 4294967264 }
 0x432   :  { %3174 = vsyncpa [#allocation4], 1 }

</bundles_post_ra>
